<compile_context>
chip_gen: v6e
topology: v6e:2x2x1
jax: 0.10.0
libtpu: 0.0.40
codegen_flags: <defaults>
</compile_context>

<pallas_src>
import functools

import jax
import jax.numpy as jnp
from jax.experimental import pallas as pl
from jax.experimental.pallas import tpu as pltpu

LANE = 128            # TPU lane width; feature dims zero-padded to a multiple of this
NEG_BIAS = -1e9       # pad value for the last bias so padded logits vanish in softmax


def _round_up(x, m):
    return ((x + m - 1) // m) * m


def _pad2d(a, rows, cols, value=0.0):
    return jnp.pad(a, ((0, rows - a.shape[0]), (0, cols - a.shape[1])),
                   constant_values=value)


def _pow2_tile(n128, max_tile, want_two):
    """Largest power-of-two multiple of 128 that is <= max_tile and <= n128.
    If want_two, stop growing before the axis collapses to a single tile so the
    'parallel' grid axis keeps >= 2 iterations (v7x megacore sharding)."""
    t = LANE
    while (t * 2 <= max_tile and t * 2 <= n128
           and (not want_two or -(-n128 // (t * 2)) >= 2)):
        t *= 2
    return t


def choose_tiles(num_nodes, max_tile_i=512, max_tile_k=2048):
    n128 = _round_up(max(num_nodes, 1), LANE)
    tile_i = _pow2_tile(n128, max_tile_i, want_two=True)     # row tile (output rows)
    tile_k = _pow2_tile(n128, max_tile_k, want_two=False)    # reduction tile (A cols)
    # Both tiles are power-of-two multiples of 128, so max() is their lcm.
    n_pad = _round_up(n128, max(tile_i, tile_k))
    return tile_i, tile_k, n_pad


def _pick_vmem_limit():
    # v5e/v6e have 128 MiB physical VMEM (scoped default only 16/32 MiB) -> raise it.
    # v7x has only 64 MiB physical -> stay conservative.
    try:
        cap = int(pltpu.get_tpu_info().vmem_capacity_bytes)
    except Exception:
        cap = None
    if cap is None:
        return 48 * 1024 * 1024
    return max(32 * 1024 * 1024, min(100 * 1024 * 1024, (cap * 3) // 4))


# ----------------------------------------------------------------------------
# Kernel 1: one GIN layer, tiled over (row tiles, reduction tiles).
#   acc    += A_tile @ X_chunk               (bf16 x bf16 MXU, f32 accumulate)
#   at k==last:
#     h     = relu(acc @ W1 + b1) @ W2 + b2  (GINConv MLP, f32)
#     h     = relu(h)                        (F.relu; dropout identity in eval)
#     out   = bf16(h * scale + shift)        (BatchNorm eval; identity on last layer)
# ----------------------------------------------------------------------------
def _make_gin_kernel(tile_k, x_resident):
    def kernel(a_ref, x_ref, w1_ref, b1_ref, w2_ref, b2_ref,
               scale_ref, shift_ref, out_ref, acc_ref):
        k = pl.program_id(1)

        @pl.when(k == 0)
        def _():
            acc_ref[...] = jnp.zeros_like(acc_ref)

        if x_resident:
            # X kept VMEM-resident for the whole layer; slice the k-th chunk here.
            start = pl.multiple_of(k * tile_k, tile_k)
            xs = x_ref[pl.ds(start, tile_k), :]
        else:
            xs = x_ref[...]
        # Native bf16 MXU matmul, f32 accumulation — no explicit cast of A.
        acc_ref[...] += jnp.dot(a_ref[...], xs, preferred_element_type=jnp.float32)

        @pl.when(k == pl.num_programs(1) - 1)
        def _():
            h = jnp.dot(acc_ref[...], w1_ref[...],
                        preferred_element_type=jnp.float32) + b1_ref[...]
            h = jnp.maximum(h, 0.0)
            h = jnp.dot(h, w2_ref[...],
                        preferred_element_type=jnp.float32) + b2_ref[...]
            h = jnp.maximum(h, 0.0)
            out_ref[...] = (h * scale_ref[...] + shift_ref[...]).astype(out_ref.dtype)

    return kernel


def gin_layer(a, x, w1, b1, w2, b2, scale, shift, *, tile_i, tile_k, vmem_limit):
    n_pad = a.shape[0]
    f_in = x.shape[1]
    f_out = w2.shape[1]
    grid = (n_pad // tile_i, n_pad // tile_k)

    # Keep X fully VMEM-resident when it fits the budget (removes the per-row-tile
    # re-streaming of X); otherwise fall back to a streamed (tile_k, f_in) block.
    x_bytes = n_pad * f_in * x.dtype.itemsize * 2          # double-buffered
    x_resident = x_bytes <= vmem_limit // 3
    if x_resident:
        x_spec = pl.BlockSpec((n_pad, f_in), lambda i, k: (0, 0))
    else:
        x_spec = pl.BlockSpec((tile_k, f_in), lambda i, k: (k, 0))

    return pl.pallas_call(
        _make_gin_kernel(tile_k, x_resident),
        out_shape=jax.ShapeDtypeStruct((n_pad, f_out), jnp.bfloat16),
        grid_spec=pltpu.PrefetchScalarGridSpec(
            num_scalar_prefetch=0,
            grid=grid,
            in_specs=[
                pl.BlockSpec((tile_i, tile_k), lambda i, k: (i, k)),   # A tile (bf16)
                x_spec,                                                # X (bf16)
                pl.BlockSpec((f_in, f_out), lambda i, k: (0, 0)),      # W1 (f32, resident)
                pl.BlockSpec((1, f_out), lambda i, k: (0, 0)),         # b1
                pl.BlockSpec((f_out, f_out), lambda i, k: (0, 0)),     # W2
                pl.BlockSpec((1, f_out), lambda i, k: (0, 0)),         # b2
                pl.BlockSpec((1, f_out), lambda i, k: (0, 0)),         # BN scale
                pl.BlockSpec((1, f_out), lambda i, k: (0, 0)),         # BN shift
            ],
            out_specs=pl.BlockSpec((tile_i, f_out), lambda i, k: (i, 0)),
            scratch_shapes=[pltpu.VMEM((tile_i, f_in), jnp.float32)],
        ),
        compiler_params=pltpu.CompilerParams(
            dimension_semantics=("parallel", "arbitrary"),
            vmem_limit_bytes=vmem_limit),
    )(a, x, w1, b1, w2, b2, scale, shift)


# ----------------------------------------------------------------------------
# Kernel 2: mean pool + post_mp + log_softmax, fused and tiled over node tiles.
#   acc    += P_tile @ h_tile                 (global_mean_pool; h bf16, P f32)
#   at k==last:
#     emb    = acc
#     z      = emb @ W3 + b3                  (Dropout eval => identity)
#     logits = z @ W4 + b4                    (padded b4 columns = -1e9)
#     out    = log_softmax(logits, axis=1)
# ----------------------------------------------------------------------------
def pool_head_kernel(p_ref, x_ref, w3_ref, b3_ref, w4_ref, b4_ref,
                     emb_ref, logp_ref, logits_ref, acc_ref):
    k = pl.program_id(0)

    @pl.when(k == 0)
    def _():
        acc_ref[...] = jnp.zeros_like(acc_ref)

    # P stays f32 so the exact 1/|graph| weights are preserved; the bf16 h tile is
    # cast per-step (tiny vs the HBM traffic it saves).
    acc_ref[...] += jnp.dot(p_ref[...], x_ref[...].astype(jnp.float32),
                            preferred_element_type=jnp.float32)

    @pl.when(k == pl.num_programs(0) - 1)
    def _():
        emb = acc_ref[...]
        emb_ref[...] = emb
        z = jnp.dot(emb, w3_ref[...],
                    preferred_element_type=jnp.float32) + b3_ref[...]
        logits = jnp.dot(z, w4_ref[...],
                         preferred_element_type=jnp.float32) + b4_ref[...]
        logits_ref[...] = logits
        m = jnp.max(logits, axis=1, keepdims=True)
        s = jnp.sum(jnp.exp(logits - m), axis=1, keepdims=True)
        logp_ref[...] = logits - m - jnp.log(s)


def pool_head(p, x, w3, b3, w4, b4, *, tile, vmem_limit):
    b = p.shape[0]
    n_pad = p.shape[1]
    h_pad = w3.shape[1]
    o_pad = w4.shape[1]
    grid = (n_pad // tile,)
    return pl.pallas_call(
        pool_head_kernel,
        out_shape=(jax.ShapeDtypeStruct((b, h_pad), jnp.float32),
                   jax.ShapeDtypeStruct((b, o_pad), jnp.float32),
                   jax.ShapeDtypeStruct((b, o_pad), jnp.float32)),
        grid_spec=pltpu.PrefetchScalarGridSpec(
            num_scalar_prefetch=0,
            grid=grid,
            in_specs=[
                pl.BlockSpec((b, tile), lambda k: (0, k)),      # P tile (f32)
                pl.BlockSpec((tile, h_pad), lambda k: (k, 0)),  # h tile (bf16)
                pl.BlockSpec((h_pad, h_pad), lambda k: (0, 0)),
                pl.BlockSpec((1, h_pad), lambda k: (0, 0)),
                pl.BlockSpec((h_pad, o_pad), lambda k: (0, 0)),
                pl.BlockSpec((1, o_pad), lambda k: (0, 0)),
            ],
            out_specs=(pl.BlockSpec((b, h_pad), lambda k: (0, 0)),
                       pl.BlockSpec((b, o_pad), lambda k: (0, 0)),
                       pl.BlockSpec((b, o_pad), lambda k: (0, 0))),
            scratch_shapes=[pltpu.VMEM((b, h_pad), jnp.float32)],
        ),
        compiler_params=pltpu.CompilerParams(
            dimension_semantics=("arbitrary",),
            vmem_limit_bytes=vmem_limit),
    )(p, x, w3, b3, w4, b4)


# ----------------------------------------------------------------------------
# Graph operand construction (single scatter-add; hoist out of jit for static graphs)
# ----------------------------------------------------------------------------
def build_graph_operands(edge_index, batch, num_nodes, num_graphs, n_pad):
    src, dst = edge_index[0], edge_index[1]
    loop = jnp.arange(num_nodes, dtype=src.dtype)
    rows = jnp.concatenate([dst, loop])          # GIN self-loop folded into (A + I)
    cols = jnp.concatenate([src, loop])
    a = jnp.zeros((n_pad, n_pad), jnp.float32).at[rows, cols].add(1.0)
    # bf16 is exact for integer edge multiplicities <= 256 (MSDroid: 0/1 + self-loop).
    a = a.astype(jnp.bfloat16)

    # Mean-pooling matrix: P[g, n] = 1/|graph g| if batch[n] == g; padded cols are 0.
    onehot = (batch[None, :] == jnp.arange(num_graphs, dtype=batch.dtype)[:, None])
    onehot = onehot.astype(jnp.float32)
    counts = jnp.maximum(onehot.sum(axis=1, keepdims=True), 1.0)
    p = _pad2d(onehot / counts, num_graphs, n_pad)
    return a, p


# ----------------------------------------------------------------------------
# Parameter construction (deterministic, PyTorch-Linear-style uniform init)
# ----------------------------------------------------------------------------
def _linear_init(key, fan_in, fan_out):
    kw, kb = jax.random.split(key)
    bound = 1.0 / jnp.sqrt(jnp.float32(fan_in))
    w = jax.random.uniform(kw, (fan_in, fan_out), jnp.float32, -bound, bound)
    b = jax.random.uniform(kb, (1, fan_out), jnp.float32, -bound, bound)
    return w, b


def init_gnn_stack_params(key, input_dim, hidden_dim, output_dim):
    keys = jax.random.split(key, 12)
    params = {}
    dims_in = [input_dim, hidden_dim, hidden_dim]
    for i in range(3):
        w1, b1 = _linear_init(keys[2 * i], dims_in[i], hidden_dim)
        w2, b2 = _linear_init(keys[2 * i + 1], hidden_dim, hidden_dim)
        params[f"conv{i}"] = (w1, b1, w2, b2)
    # BatchNorm (pyg_nn.BatchNorm == BatchNorm1d), eval mode, folded:
    #   scale = gamma / sqrt(running_var + 1e-5);  shift = beta - running_mean * scale
    for i in range(2):
        gamma = 1.0 + 0.05 * jax.random.normal(keys[6 + i], (1, hidden_dim), jnp.float32)
        beta = 0.05 * jax.random.normal(keys[8 + i], (1, hidden_dim), jnp.float32)
        running_mean = jnp.zeros((1, hidden_dim), jnp.float32)
        running_var = jnp.ones((1, hidden_dim), jnp.float32)
        scale = gamma / jnp.sqrt(running_var + 1e-5)
        shift = beta - running_mean * scale
        params[f"norm{i}"] = (scale, shift)
    params["post0"] = _linear_init(keys[10], hidden_dim, hidden_dim)
    params["post1"] = _linear_init(keys[11], hidden_dim, output_dim)
    return params


# ----------------------------------------------------------------------------
# Forward pass (layout / padding glue in plain JAX, hot path in Pallas)
# ----------------------------------------------------------------------------
def gnn_stack_forward(params, x, edge_index, batch, num_graphs,
                      max_tile_i=512, max_tile_k=2048):
    n, f = x.shape
    hidden = params["conv0"][2].shape[1]
    out_dim = params["post1"][0].shape[1]

    f_pad = _round_up(f, LANE)
    h_pad = _round_up(hidden, LANE)
    o_pad = _round_up(out_dim, LANE)

    tile_i, tile_k, n_pad = choose_tiles(n, max_tile_i, max_tile_k)
    vmem_limit = _pick_vmem_limit()

    a, p = build_graph_operands(edge_index, batch, n, num_graphs, n_pad)

    # Node features: zero-pad to lane width / node tiles; bf16 between layers.
    h = _pad2d(x, n_pad, f_pad).astype(jnp.bfloat16)

    ones = jnp.ones((1, h_pad), jnp.float32)
    zeros = jnp.zeros((1, h_pad), jnp.float32)

    for i in range(3):
        w1, b1, w2, b2 = params[f"conv{i}"]
        in_pad = f_pad if i == 0 else h_pad
        w1p = _pad2d(w1, in_pad, h_pad)
        b1p = _pad2d(b1, 1, h_pad)
        w2p = _pad2d(w2, h_pad, h_pad)
        b2p = _pad2d(b2, 1, h_pad)
        if i < 2:
            scale, shift = params[f"norm{i}"]
            scalep = _pad2d(scale, 1, h_pad, value=1.0)
            shiftp = _pad2d(shift, 1, h_pad)
        else:
            scalep, shiftp = ones, zeros     # last layer: no norm (identity)
        h = gin_layer(a, h, w1p, b1p, w2p, b2p, scalep, shiftp,
                      tile_i=tile_i, tile_k=tile_k, vmem_limit=vmem_limit)

    w3, b3 = params["post0"]
    w4, b4 = params["post1"]
    w3p = _pad2d(w3, h_pad, h_pad)
    b3p = _pad2d(b3, 1, h_pad)
    w4p = _pad2d(w4, h_pad, o_pad)
    b4p = _pad2d(b4, 1, o_pad, value=NEG_BIAS)   # padded logits -> softmax-invisible

    emb, logp, logits = pool_head(p, h, w3p, b3p, w4p, b4p,
                                  tile=tile_k, vmem_limit=vmem_limit)
    return emb[:, :hidden], logp[:, :out_dim], logits[:, :out_dim]


# ----------------------------------------------------------------------------
# Pure-JAX f32 reference for the correctness sanity check
# ----------------------------------------------------------------------------
def gnn_stack_reference(params, x, edge_index, batch, num_graphs):
    n = x.shape[0]
    src, dst = edge_index[0], edge_index[1]
    a = jnp.zeros((n, n), jnp.float32).at[dst, src].add(1.0)
    onehot = (batch[None, :] == jnp.arange(num_graphs, dtype=batch.dtype)[:, None])
    onehot = onehot.astype(jnp.float32)
    counts = jnp.maximum(onehot.sum(axis=1, keepdims=True), 1.0)
    p = onehot / counts

    h = x
    for i in range(3):
        w1, b1, w2, b2 = params[f"conv{i}"]
        agg = a @ h + h
        z = jnp.maximum(agg @ w1 + b1, 0.0) @ w2 + b2
        z = jnp.maximum(z, 0.0)
        if i < 2:
            scale, shift = params[f"norm{i}"]
            z = z * scale + shift
        h = z
    emb = p @ h
    w3, b3 = params["post0"]
    w4, b4 = params["post1"]
    logits = (emb @ w3 + b3) @ w4 + b4
    out = jax.nn.log_softmax(logits, axis=1)
    return emb, out, logits


if __name__ == "__main__":
    input_dim, hidden_dim, output_dim = 16, 32, 4
    num_nodes, num_edges, num_graphs = 200, 600, 2

    key = jax.random.PRNGKey(0)
    k_param, k_x, k_src, k_dst = jax.random.split(key, 4)

    params = init_gnn_stack_params(k_param, input_dim, hidden_dim, output_dim)

    x = jax.random.normal(k_x, (num_nodes, input_dim), jnp.float32)
    src = jax.random.randint(k_src, (num_edges,), 0, num_nodes, jnp.int32)
    dst = jax.random.randint(k_dst, (num_edges,), 0, num_nodes, jnp.int32)
    edge_index = jnp.stack([src, dst], axis=0)                      # [2, E]
    batch = jnp.concatenate([jnp.zeros(num_nodes // 2, jnp.int32),
                             jnp.ones(num_nodes - num_nodes // 2, jnp.int32)])

    # Small tiles -> n_pad=256, GIN grid (2, 2): exercises both the row-parallel axis
    # and the k-accumulation with the resident-X in-kernel slicing.
    fwd_small = jax.jit(functools.partial(gnn_stack_forward, num_graphs=num_graphs,
                                          max_tile_i=128, max_tile_k=128))
    # Default tile policy (still >= 2 row tiles thanks to the tile chooser).
    fwd_default = jax.jit(functools.partial(gnn_stack_forward, num_graphs=num_graphs))

    with jax.default_matmul_precision("float32"):
        emb_r, out_r, logits_r = gnn_stack_reference(params, x, edge_index, batch,
                                                     num_graphs)

    for fwd in (fwd_small, fwd_default):
        emb, out, logits = fwd(params, x, edge_index, batch)
        jax.block_until_ready((emb, out, logits))

        assert emb.shape == (num_graphs, hidden_dim)
        assert out.shape == (num_graphs, output_dim)
        assert logits.shape == (num_graphs, output_dim)
        # bf16 activations + bf16 MXU aggregation -> relative-error budget vs f32 ref.
        assert jnp.allclose(emb, emb_r, atol=4e-2, rtol=4e-2)
        assert jnp.allclose(logits, logits_r, atol=4e-2, rtol=4e-2)
        assert jnp.allclose(out, out_r, atol=4e-2, rtol=4e-2)

    print("KERNEL_OK")
</pallas_src>

<mosaic_0001>
module attributes {stable_mosaic.version = 11 : i64} {
  func.func private @main(%arg0: i32) attributes {dimension_semantics = [#tpu.dimension_semantics<core_parallel>], iteration_bounds = array<i64: 2>, tpu.core_type = #tpu.core_type<sc_scalar_subcore>, window_params = []} {
    return
  }
}

module attributes {stable_mosaic.version = 11 : i64} {
  func.func private @main(%arg0: i32) attributes {dimension_semantics = [#tpu.dimension_semantics<core_parallel>], iteration_bounds = array<i64: 2>, tpu.core_type = #tpu.core_type<sc_scalar_subcore>, window_params = []} {
    return
  }
}

module attributes {stable_mosaic.version = 11 : i64} {
  func.func @kernel(%arg0: i32, %arg1: i32, %arg2: memref<128x128xbf16, #tpu.memory_space<vmem>>, %arg3: memref<256x128xbf16, #tpu.memory_space<vmem>>, %arg4: memref<128x128xf32, #tpu.memory_space<vmem>>, %arg5: memref<1x128xf32, #tpu.memory_space<vmem>>, %arg6: memref<128x128xf32, #tpu.memory_space<vmem>>, %arg7: memref<1x128xf32, #tpu.memory_space<vmem>>, %arg8: memref<1x128xf32, #tpu.memory_space<vmem>>, %arg9: memref<1x128xf32, #tpu.memory_space<vmem>>, %arg10: memref<128x128xbf16, #tpu.memory_space<vmem>>, %arg11: memref<128x128xf32, #tpu.memory_space<vmem>>) attributes {dimension_semantics = [#tpu.dimension_semantics<parallel>, #tpu.dimension_semantics<arbitrary>], iteration_bounds = array<i64: 2, 2>, scalar_prefetch = 0 : i64, scratch_operands = 1 : i64, tpu.core_type = #tpu.core_type<tc>, window_params = [{transform_indices = @transform_0, window_bounds = array<i64: 128, 128>}, {pipeline_mode = #tpu.pipeline_mode<synchronous>, transform_indices = @transform_1, window_bounds = array<i64: 256, 128>}, {pipeline_mode = #tpu.pipeline_mode<synchronous>, transform_indices = @transform_2, window_bounds = array<i64: 128, 128>}, {pipeline_mode = #tpu.pipeline_mode<synchronous>, transform_indices = @transform_3, window_bounds = array<i64: 1, 128>}, {pipeline_mode = #tpu.pipeline_mode<synchronous>, transform_indices = @transform_4, window_bounds = array<i64: 128, 128>}, {pipeline_mode = #tpu.pipeline_mode<synchronous>, transform_indices = @transform_5, window_bounds = array<i64: 1, 128>}, {pipeline_mode = #tpu.pipeline_mode<synchronous>, transform_indices = @transform_6, window_bounds = array<i64: 1, 128>}, {pipeline_mode = #tpu.pipeline_mode<synchronous>, transform_indices = @transform_7, window_bounds = array<i64: 1, 128>}, {transform_indices = @transform_8, window_bounds = array<i64: 128, 128>}]} {
    %c0_i32 = arith.constant 0 : i32
    %0 = arith.cmpi eq, %arg1, %c0_i32 : i32
    %1 = arith.extui %0 : i1 to i32
    %c0_i32_0 = arith.constant 0 : i32
    %2 = arith.cmpi ne, %1, %c0_i32_0 : i32
    scf.if %2 {
      %cst_8 = arith.constant 0.000000e+00 : f32
      %15 = vector.broadcast %cst_8 : f32 to vector<128x128xf32>
      %c0_9 = arith.constant 0 : index
      %c0_10 = arith.constant 0 : index
      %16 = vector.load %arg11[%c0_9, %c0_10] : memref<128x128xf32, #tpu.memory_space<vmem>>, vector<128x128xf32>
      tpu.vector_store %arg11[%c0_9, %c0_10], %15 {strides = array<i32>} : memref<128x128xf32, #tpu.memory_space<vmem>>, vector<128x128xf32>,
    } else {
    }
    %c128_i32 = arith.constant 128 : i32
    %3 = arith.muli %arg1, %c128_i32 : i32
    %4 = tpu.assume_multiple %3, 128 : i32
    %5 = arith.index_cast %4 : i32 to index
    %c0 = arith.constant 0 : index
    %6 = vector.load %arg3[%5, %c0] : memref<256x128xbf16, #tpu.memory_space<vmem>>, vector<128x128xbf16>
    %c0_1 = arith.constant 0 : index
    %c0_2 = arith.constant 0 : index
    %7 = vector.load %arg11[%c0_1, %c0_2] : memref<128x128xf32, #tpu.memory_space<vmem>>, vector<128x128xf32>
    %c0_3 = arith.constant 0 : index
    %c0_4 = arith.constant 0 : index
    %8 = vector.load %arg2[%c0_3, %c0_4] : memref<128x128xbf16, #tpu.memory_space<vmem>>, vector<128x128xbf16>
    %cst = arith.constant dense<0.000000e+00> : vector<128x128xf32>
    %9 = tpu.matmul %8, %6, %cst {dimension_numbers = #tpu.dot_dimension_numbers<[1], [0], [0], [1], [0, 0, 1, 1], [], []>} : vector<128x128xbf16>, vector<128x128xbf16>, vector<128x128xf32> -> vector<128x128xf32>
    %10 = arith.addf %7, %9 : vector<128x128xf32>
    %c0_5 = arith.constant 0 : index
    %c0_6 = arith.constant 0 : index
    %11 = vector.load %arg11[%c0_5, %c0_6] : memref<128x128xf32, #tpu.memory_space<vmem>>, vector<128x128xf32>
    tpu.vector_store %arg11[%c0_5, %c0_6], %10 {strides = array<i32>} : memref<128x128xf32, #tpu.memory_space<vmem>>, vector<128x128xf32>,
    %c1_i32 = arith.constant 1 : i32
    %12 = arith.cmpi eq, %arg1, %c1_i32 : i32
    %13 = arith.extui %12 : i1 to i32
    %c0_i32_7 = arith.constant 0 : i32
    %14 = arith.cmpi ne, %13, %c0_i32_7 : i32
    scf.if %14 {
      %c0_8 = arith.constant 0 : index
      %c0_9 = arith.constant 0 : index
      %15 = vector.load %arg11[%c0_8, %c0_9] : memref<128x128xf32, #tpu.memory_space<vmem>>, vector<128x128xf32>
      %c0_10 = arith.constant 0 : index
      %c0_11 = arith.constant 0 : index
      %16 = vector.load %arg4[%c0_10, %c0_11] : memref<128x128xf32, #tpu.memory_space<vmem>>, vector<128x128xf32>
      %cst_12 = arith.constant dense<0.000000e+00> : vector<128x128xf32>
      %17 = tpu.matmul %15, %16, %cst_12 {dimension_numbers = #tpu.dot_dimension_numbers<[1], [0], [0], [1], [0, 0, 1, 1], [], []>} : vector<128x128xf32>, vector<128x128xf32>, vector<128x128xf32> -> vector<128x128xf32>
      %c0_13 = arith.constant 0 : index
      %c0_14 = arith.constant 0 : index
      %18 = vector.load %arg5[%c0_13, %c0_14] : memref<1x128xf32, #tpu.memory_space<vmem>>, vector<1x128xf32>
      %19 = vector.broadcast %18 : vector<1x128xf32> to vector<128x128xf32>
      %20 = arith.addf %17, %19 : vector<128x128xf32>
      %cst_15 = arith.constant 0.000000e+00 : f32
      %21 = vector.broadcast %cst_15 : f32 to vector<128x128xf32>
      %22 = arith.maximumf %20, %21 : vector<128x128xf32>
      %c0_16 = arith.constant 0 : index
      %c0_17 = arith.constant 0 : index
      %23 = vector.load %arg6[%c0_16, %c0_17] : memref<128x128xf32, #tpu.memory_space<vmem>>, vector<128x128xf32>
      %cst_18 = arith.constant dense<0.000000e+00> : vector<128x128xf32>
      %24 = tpu.matmul %22, %23, %cst_18 {dimension_numbers = #tpu.dot_dimension_numbers<[1], [0], [0], [1], [0, 0, 1, 1], [], []>} : vector<128x128xf32>, vector<128x128xf32>, vector<128x128xf32> -> vector<128x128xf32>
      %c0_19 = arith.constant 0 : index
      %c0_20 = arith.constant 0 : index
      %25 = vector.load %arg7[%c0_19, %c0_20] : memref<1x128xf32, #tpu.memory_space<vmem>>, vector<1x128xf32>
      %26 = vector.broadcast %25 : vector<1x128xf32> to vector<128x128xf32>
      %27 = arith.addf %24, %26 : vector<128x128xf32>
      %cst_21 = arith.constant 0.000000e+00 : f32
      %28 = vector.broadcast %cst_21 : f32 to vector<128x128xf32>
      %29 = arith.maximumf %27, %28 : vector<128x128xf32>
      %c0_22 = arith.constant 0 : index
      %c0_23 = arith.constant 0 : index
      %30 = vector.load %arg8[%c0_22, %c0_23] : memref<1x128xf32, #tpu.memory_space<vmem>>, vector<1x128xf32>
      %31 = vector.broadcast %30 : vector<1x128xf32> to vector<128x128xf32>
      %32 = arith.mulf %29, %31 : vector<128x128xf32>
      %c0_24 = arith.constant 0 : index
      %c0_25 = arith.constant 0 : index
      %33 = vector.load %arg9[%c0_24, %c0_25] : memref<1x128xf32, #tpu.memory_space<vmem>>, vector<1x128xf32>
      %34 = vector.broadcast %33 : vector<1x128xf32> to vector<128x128xf32>
      %35 = arith.addf %32, %34 : vector<128x128xf32>
      %36 = arith.truncf %35 : vector<128x128xf32> to vector<128x128xbf16>
      %c0_26 = arith.constant 0 : index
      %c0_27 = arith.constant 0 : index
      %37 = vector.load %arg10[%c0_26, %c0_27] : memref<128x128xbf16, #tpu.memory_space<vmem>>, vector<128x128xbf16>
      tpu.vector_store %arg10[%c0_26, %c0_27], %36 {strides = array<i32>} : memref<128x128xbf16, #tpu.memory_space<vmem>>, vector<128x128xbf16>,
    } else {
    }
    return
  }
  func.func @transform_0(%arg0: i32, %arg1: i32) -> (i32, i32) {
    %c0_i32 = arith.constant 0 : i32
    return %arg0, %arg1 : i32, i32
  }
  func.func @transform_1(%arg0: i32, %arg1: i32) -> (i32, i32) {
    %c0_i32 = arith.constant 0 : i32
    %c0_i32_0 = arith.constant 0 : i32
    %c0_i32_1 = arith.constant 0 : i32
    return %c0_i32, %c0_i32_0 : i32, i32
  }
  func.func @transform_2(%arg0: i32, %arg1: i32) -> (i32, i32) {
    %c0_i32 = arith.constant 0 : i32
    %c0_i32_0 = arith.constant 0 : i32
    %c0_i32_1 = arith.constant 0 : i32
    return %c0_i32, %c0_i32_0 : i32, i32
  }
  func.func @transform_3(%arg0: i32, %arg1: i32) -> (i32, i32) {
    %c0_i32 = arith.constant 0 : i32
    %c0_i32_0 = arith.constant 0 : i32
    %c0_i32_1 = arith.constant 0 : i32
    return %c0_i32, %c0_i32_0 : i32, i32
  }
  func.func @transform_4(%arg0: i32, %arg1: i32) -> (i32, i32) {
    %c0_i32 = arith.constant 0 : i32
    %c0_i32_0 = arith.constant 0 : i32
    %c0_i32_1 = arith.constant 0 : i32
    return %c0_i32, %c0_i32_0 : i32, i32
  }
  func.func @transform_5(%arg0: i32, %arg1: i32) -> (i32, i32) {
    %c0_i32 = arith.constant 0 : i32
    %c0_i32_0 = arith.constant 0 : i32
    %c0_i32_1 = arith.constant 0 : i32
    return %c0_i32, %c0_i32_0 : i32, i32
  }
  func.func @transform_6(%arg0: i32, %arg1: i32) -> (i32, i32) {
    %c0_i32 = arith.constant 0 : i32
    %c0_i32_0 = arith.constant 0 : i32
    %c0_i32_1 = arith.constant 0 : i32
    return %c0_i32, %c0_i32_0 : i32, i32
  }
  func.func @transform_7(%arg0: i32, %arg1: i32) -> (i32, i32) {
    %c0_i32 = arith.constant 0 : i32
    %c0_i32_0 = arith.constant 0 : i32
    %c0_i32_1 = arith.constant 0 : i32
    return %c0_i32, %c0_i32_0 : i32, i32
  }
  func.func @transform_8(%arg0: i32, %arg1: i32) -> (i32, i32) {
    %c0_i32 = arith.constant 0 : i32
    %c0_i32_0 = arith.constant 0 : i32
    return %arg0, %c0_i32 : i32, i32
  }
}

module attributes {stable_mosaic.version = 11 : i64} {
  func.func @pool_head_kernel(%arg0: i32, %arg1: memref<2x128xf32, #tpu.memory_space<vmem>>, %arg2: memref<128x128xbf16, #tpu.memory_space<vmem>>, %arg3: memref<128x128xf32, #tpu.memory_space<vmem>>, %arg4: memref<1x128xf32, #tpu.memory_space<vmem>>, %arg5: memref<128x128xf32, #tpu.memory_space<vmem>>, %arg6: memref<1x128xf32, #tpu.memory_space<vmem>>, %arg7: memref<2x128xf32, #tpu.memory_space<vmem>>, %arg8: memref<2x128xf32, #tpu.memory_space<vmem>>, %arg9: memref<2x128xf32, #tpu.memory_space<vmem>>, %arg10: memref<2x128xf32, #tpu.memory_space<vmem>>) attributes {dimension_semantics = [#tpu.dimension_semantics<arbitrary>], iteration_bounds = array<i64: 2>, scalar_prefetch = 0 : i64, scratch_operands = 1 : i64, tpu.core_type = #tpu.core_type<tc>, window_params = [{transform_indices = @transform_0, window_bounds = array<i64: 2, 128>}, {transform_indices = @transform_1, window_bounds = array<i64: 128, 128>}, {pipeline_mode = #tpu.pipeline_mode<synchronous>, transform_indices = @transform_2, window_bounds = array<i64: 128, 128>}, {pipeline_mode = #tpu.pipeline_mode<synchronous>, transform_indices = @transform_3, window_bounds = array<i64: 1, 128>}, {pipeline_mode = #tpu.pipeline_mode<synchronous>, transform_indices = @transform_4, window_bounds = array<i64: 128, 128>}, {pipeline_mode = #tpu.pipeline_mode<synchronous>, transform_indices = @transform_5, window_bounds = array<i64: 1, 128>}, {pipeline_mode = #tpu.pipeline_mode<synchronous>, transform_indices = @transform_6, window_bounds = array<i64: 2, 128>}, {pipeline_mode = #tpu.pipeline_mode<synchronous>, transform_indices = @transform_7, window_bounds = array<i64: 2, 128>}, {pipeline_mode = #tpu.pipeline_mode<synchronous>, transform_indices = @transform_8, window_bounds = array<i64: 2, 128>}]} {
    %c0_i32 = arith.constant 0 : i32
    %0 = arith.cmpi eq, %arg0, %c0_i32 : i32
    %1 = arith.extui %0 : i1 to i32
    %c0_i32_0 = arith.constant 0 : i32
    %2 = arith.cmpi ne, %1, %c0_i32_0 : i32
    scf.if %2 {
      %cst_9 = arith.constant 0.000000e+00 : f32
      %13 = vector.broadcast %cst_9 : f32 to vector<2x128xf32>
      %c0_10 = arith.constant 0 : index
      %c0_11 = arith.constant 0 : index
      %14 = vector.load %arg10[%c0_10, %c0_11] : memref<2x128xf32, #tpu.memory_space<vmem>>, vector<2x128xf32>
      tpu.vector_store %arg10[%c0_10, %c0_11], %13 {strides = array<i32>} : memref<2x128xf32, #tpu.memory_space<vmem>>, vector<2x128xf32>,
    } else {
    }
    %c0 = arith.constant 0 : index
    %c0_1 = arith.constant 0 : index
    %3 = vector.load %arg10[%c0, %c0_1] : memref<2x128xf32, #tpu.memory_space<vmem>>, vector<2x128xf32>
    %c0_2 = arith.constant 0 : index
    %c0_3 = arith.constant 0 : index
    %4 = vector.load %arg1[%c0_2, %c0_3] : memref<2x128xf32, #tpu.memory_space<vmem>>, vector<2x128xf32>
    %c0_4 = arith.constant 0 : index
    %c0_5 = arith.constant 0 : index
    %5 = vector.load %arg2[%c0_4, %c0_5] : memref<128x128xbf16, #tpu.memory_space<vmem>>, vector<128x128xbf16>
    %6 = arith.extf %5 : vector<128x128xbf16> to vector<128x128xf32>
    %cst = arith.constant dense<0.000000e+00> : vector<2x128xf32>
    %7 = tpu.matmul %4, %6, %cst {dimension_numbers = #tpu.dot_dimension_numbers<[1], [0], [0], [1], [0, 0, 1, 1], [], []>} : vector<2x128xf32>, vector<128x128xf32>, vector<2x128xf32> -> vector<2x128xf32>
    %8 = arith.addf %3, %7 : vector<2x128xf32>
    %c0_6 = arith.constant 0 : index
    %c0_7 = arith.constant 0 : index
    %9 = vector.load %arg10[%c0_6, %c0_7] : memref<2x128xf32, #tpu.memory_space<vmem>>, vector<2x128xf32>
    tpu.vector_store %arg10[%c0_6, %c0_7], %8 {strides = array<i32>} : memref<2x128xf32, #tpu.memory_space<vmem>>, vector<2x128xf32>,
    %c1_i32 = arith.constant 1 : i32
    %10 = arith.cmpi eq, %arg0, %c1_i32 : i32
    %11 = arith.extui %10 : i1 to i32
    %c0_i32_8 = arith.constant 0 : i32
    %12 = arith.cmpi ne, %11, %c0_i32_8 : i32
    scf.if %12 {
      %c0_9 = arith.constant 0 : index
      %c0_10 = arith.constant 0 : index
      %13 = vector.load %arg10[%c0_9, %c0_10] : memref<2x128xf32, #tpu.memory_space<vmem>>, vector<2x128xf32>
      %c0_11 = arith.constant 0 : index
      %c0_12 = arith.constant 0 : index
      %14 = vector.load %arg7[%c0_11, %c0_12] : memref<2x128xf32, #tpu.memory_space<vmem>>, vector<2x128xf32>
      tpu.vector_store %arg7[%c0_11, %c0_12], %13 {strides = array<i32>} : memref<2x128xf32, #tpu.memory_space<vmem>>, vector<2x128xf32>,
      %c0_13 = arith.constant 0 : index
      %c0_14 = arith.constant 0 : index
      %15 = vector.load %arg3[%c0_13, %c0_14] : memref<128x128xf32, #tpu.memory_space<vmem>>, vector<128x128xf32>
      %cst_15 = arith.constant dense<0.000000e+00> : vector<2x128xf32>
      %16 = tpu.matmul %13, %15, %cst_15 {dimension_numbers = #tpu.dot_dimension_numbers<[1], [0], [0], [1], [0, 0, 1, 1], [], []>} : vector<2x128xf32>, vector<128x128xf32>, vector<2x128xf32> -> vector<2x128xf32>
      %c0_16 = arith.constant 0 : index
      %c0_17 = arith.constant 0 : index
      %17 = vector.load %arg4[%c0_16, %c0_17] : memref<1x128xf32, #tpu.memory_space<vmem>>, vector<1x128xf32>
      %18 = vector.broadcast %17 : vector<1x128xf32> to vector<2x128xf32>
      %19 = arith.addf %16, %18 : vector<2x128xf32>
      %c0_18 = arith.constant 0 : index
      %c0_19 = arith.constant 0 : index
      %20 = vector.load %arg5[%c0_18, %c0_19] : memref<128x128xf32, #tpu.memory_space<vmem>>, vector<128x128xf32>
      %cst_20 = arith.constant dense<0.000000e+00> : vector<2x128xf32>
      %21 = tpu.matmul %19, %20, %cst_20 {dimension_numbers = #tpu.dot_dimension_numbers<[1], [0], [0], [1], [0, 0, 1, 1], [], []>} : vector<2x128xf32>, vector<128x128xf32>, vector<2x128xf32> -> vector<2x128xf32>
      %c0_21 = arith.constant 0 : index
      %c0_22 = arith.constant 0 : index
      %22 = vector.load %arg6[%c0_21, %c0_22] : memref<1x128xf32, #tpu.memory_space<vmem>>, vector<1x128xf32>
      %23 = vector.broadcast %22 : vector<1x128xf32> to vector<2x128xf32>
      %24 = arith.addf %21, %23 : vector<2x128xf32>
      %c0_23 = arith.constant 0 : index
      %c0_24 = arith.constant 0 : index
      %25 = vector.load %arg9[%c0_23, %c0_24] : memref<2x128xf32, #tpu.memory_space<vmem>>, vector<2x128xf32>
      tpu.vector_store %arg9[%c0_23, %c0_24], %24 {strides = array<i32>} : memref<2x128xf32, #tpu.memory_space<vmem>>, vector<2x128xf32>,
      %cst_25 = arith.constant dense<0xFF800000> : vector<2xf32>
      %26 = vector.multi_reduction <maximumf>, %24, %cst_25 [1] : vector<2x128xf32> to vector<2xf32>
      %27 = vector.shape_cast %26 : vector<2xf32> to vector<2x1xf32>
      %28 = vector.broadcast %27 : vector<2x1xf32> to vector<2x128xf32>
      %29 = arith.subf %24, %28 : vector<2x128xf32>
      %30 = math.exp %29 : vector<2x128xf32>
      %cst_26 = arith.constant dense<0.000000e+00> : vector<2xf32>
      %31 = vector.multi_reduction <add>, %30, %cst_26 [1] : vector<2x128xf32> to vector<2xf32>
      %32 = vector.shape_cast %31 : vector<2xf32> to vector<2x1xf32>
      %33 = vector.broadcast %27 : vector<2x1xf32> to vector<2x128xf32>
      %34 = arith.subf %24, %33 : vector<2x128xf32>
      %35 = math.log %32 : vector<2x1xf32>
      %36 = vector.broadcast %35 : vector<2x1xf32> to vector<2x128xf32>
      %37 = arith.subf %34, %36 : vector<2x128xf32>
      %c0_27 = arith.constant 0 : index
      %c0_28 = arith.constant 0 : index
      %38 = vector.load %arg8[%c0_27, %c0_28] : memref<2x128xf32, #tpu.memory_space<vmem>>, vector<2x128xf32>
      tpu.vector_store %arg8[%c0_27, %c0_28], %37 {strides = array<i32>} : memref<2x128xf32, #tpu.memory_space<vmem>>, vector<2x128xf32>,
    } else {
    }
    return
  }
  func.func @transform_0(%arg0: i32) -> (i32, i32) {
    %c0_i32 = arith.constant 0 : i32
    %c0_i32_0 = arith.constant 0 : i32
    return %c0_i32, %arg0 : i32, i32
  }
  func.func @transform_1(%arg0: i32) -> (i32, i32) {
    %c0_i32 = arith.constant 0 : i32
    %c0_i32_0 = arith.constant 0 : i32
    return %arg0, %c0_i32 : i32, i32
  }
  func.func @transform_2(%arg0: i32) -> (i32, i32) {
    %c0_i32 = arith.constant 0 : i32
    %c0_i32_0 = arith.constant 0 : i32
    %c0_i32_1 = arith.constant 0 : i32
    return %c0_i32, %c0_i32_0 : i32, i32
  }
  func.func @transform_3(%arg0: i32) -> (i32, i32) {
    %c0_i32 = arith.constant 0 : i32
    %c0_i32_0 = arith.constant 0 : i32
    %c0_i32_1 = arith.constant 0 : i32
    return %c0_i32, %c0_i32_0 : i32, i32
  }
  func.func @transform_4(%arg0: i32) -> (i32, i32) {
    %c0_i32 = arith.constant 0 : i32
    %c0_i32_0 = arith.constant 0 : i32
    %c0_i32_1 = arith.constant 0 : i32
    return %c0_i32, %c0_i32_0 : i32, i32
  }
  func.func @transform_5(%arg0: i32) -> (i32, i32) {
    %c0_i32 = arith.constant 0 : i32
    %c0_i32_0 = arith.constant 0 : i32
    %c0_i32_1 = arith.constant 0 : i32
    return %c0_i32, %c0_i32_0 : i32, i32
  }
  func.func @transform_6(%arg0: i32) -> (i32, i32) {
    %c0_i32 = arith.constant 0 : i32
    %c0_i32_0 = arith.constant 0 : i32
    %c0_i32_1 = arith.constant 0 : i32
    return %c0_i32, %c0_i32_0 : i32, i32
  }
  func.func @transform_7(%arg0: i32) -> (i32, i32) {
    %c0_i32 = arith.constant 0 : i32
    %c0_i32_0 = arith.constant 0 : i32
    %c0_i32_1 = arith.constant 0 : i32
    return %c0_i32, %c0_i32_0 : i32, i32
  }
  func.func @transform_8(%arg0: i32) -> (i32, i32) {
    %c0_i32 = arith.constant 0 : i32
    %c0_i32_0 = arith.constant 0 : i32
    %c0_i32_1 = arith.constant 0 : i32
    return %c0_i32, %c0_i32_0 : i32, i32
  }
}

</mosaic_0001>

<bundles_post_ra>
// kernel: gnn_stack_forward.7
= control target key start
LH: loop header
LB: loop body
LE: loop exit
PB: predicated region body
PF: predicated region fallthrough
CT: control target
= control target key end

     0   :  { %14 = vsyncpa [#allocation4], 0  ;;  %s1326_s0 = inlined_call_operand.vmem [shape: f32[2,256], index: 0, kind: input, shape index: {}]   ;;  %s1327_s1 = inlined_call_operand.vmem [shape: bf16[256,128], index: 1, kind: input, shape index: {}]   ;;  %s1328_s2 = inlined_call_operand.vmem [shape: f32[128,128], index: 2, kind: input, shape index: {}]   ;;  %s1329_s3 = inlined_call_operand.vmem [shape: f32[1,128], index: 3, kind: input, shape index: {}]   ;;  %s1330_s4 = inlined_call_operand.vmem [shape: f32[128,128], index: 4, kind: input, shape index: {}]   ;;  %s1331_s5 = inlined_call_operand.vmem [shape: f32[1,128], index: 5, kind: input, shape index: {}]   ;;  %s1332_s6 = inlined_call_operand.hbm [shape: f32[2,128], index: 6, kind: output, shape index: {0}]   ;;  %s1333_s7 = inlined_call_operand.hbm [shape: f32[2,128], index: 7, kind: output, shape index: {1}]   ;;  %s1334_s8 = inlined_call_operand.hbm [shape: f32[2,128], index: 8, kind: output, shape index: {2}]  }
   0x1   :  { %15 = vsyncpa [#allocation6], 0  ;;  %s1119_s27 = smov 0  }
   0x2 LB: > { %s1125_s28 = sadd.s32 4294967295, %s1064_s27   ;;  %p729_p0 = scmp.ge.s32.totalorder %s1064_s27, 1  ;;  %s1064_s27 = sphi %s1119_s27, %s21_s27  }
   0x3   : > { %p264_p1 = scmp.lt.s32.totalorder %s1064_s27, 3 }
   0x5   : > { %p265_p2 = pnand %p729_p0, %p264_p1 }
   0x6   : > { %p297_p3 = scmp.lt.s32.totalorder (!%p265_p2), %s1125_s28, 1  ;;  %s731_s29 = sshll.u32 (!%p265_p2), %s1125_s28, 4 }
   0x7   : > { %268 = sbr.rel (%p265_p2) target bundleno = 1029 (0x405), region = 44  ;;  %p302_p4 = scmp.lt.s32.totalorder (!%p265_p2), %s731_s29, 31 }
   0x8   : > { %p733_p5 = scmp.ne.s32.totalorder (!%p265_p2), %s1125_s28, 0 }
   0xc   : > { %s298_s30 = scalar_select %p297_p3, %s1125_s28, 1 }
   0xd   : > { %s1336_s29 = smov (!%p302_p4, %s731_s29), 31  ;;  %310 = sbr.rel (%p733_p5) target bundleno = 20 (0x14), region = 48 }
   0xe   : > { %s730_s9 = sshll.u32 %s298_s30, 1  ;;  %s732_s13 = sshll.u32 %s1336_s29, 2 }
   0xf   : > { %s1135_s12 = scalar_lea.vmem %s1326_s0, %s730_s9  ;;  %s1140_s16 = scalar_lea.vmem %s1327_s1, %s732_s13 }
  0x12   : > { %v1066_v0 = vmov 0.0  }
  0x13   : > { %311 = vst [vmem:[#allocation2] sm:$0x3] %v1066_v0 }
  0x14 PF: > { %v783_v1 = vld [vmem:[%s1140_s16 + $0x38] sm:$0xff]   ;;  %v782_v2 = vld [vmem:[%s1140_s16 + $0x30] sm:$0xff]   ;;  %v1067_v3 = vmov 0.0   ;;  %vm1068_vm0 = vmmov 0   ;;  %v781_v7 = vld [vmem:[%s1140_s16 + $0x28] sm:$0xff]   ;;  %p734_p6 = scmp.ne.s32.totalorder %s1125_s28, 1 }
  0x15   : > { %835 = vmatprep.subr.mxu0 %v1067_v3  ;;  %v775_v4 = vunpack.c.l.bf16 %v783_v1  ;;  %v776_v5 = vunpack.c.h.bf16 %v783_v1  ;;  %867 = vmatprep.mubr.msk.f32.mxu0 %vm1068_vm0, %v1067_v3  ;;  %v772_v6 = vunpack.c.h.bf16 %v782_v2  ;;  %v771_v8 = vunpack.c.l.bf16 %v782_v2  ;;  %v780_v10 = vld [vmem:[%s1140_s16 + $0x20] sm:$0xff]   ;;  %v779_v13 = vld [vmem:[%s1140_s16 + $0x18] sm:$0xff]   ;;  %v778_v16 = vld [vmem:[%s1140_s16 + $0x10] sm:$0xff]  }
  0x16   : > { %v768_v9 = vunpack.c.h.bf16 %v781_v7  ;;  %v767_v11 = vunpack.c.l.bf16 %v781_v7  ;;  %v764_v12 = vunpack.c.h.bf16 %v780_v10  ;;  %v763_v14 = vunpack.c.l.bf16 %v780_v10  ;;  %v777_v19 = vld [vmem:[%s1140_s16 + $0x8] sm:$0xff]   ;;  %v746_v22 = vld [vmem:[%s1140_s16] sm:$0xff]  }
  0x17   : > { %836 = vmatpush3.msra.mxu0 %v776_v5  ;;  %v760_v15 = vunpack.c.h.bf16 %v779_v13  ;;  %v759_v17 = vunpack.c.l.bf16 %v779_v13  ;;  %v756_v18 = vunpack.c.h.bf16 %v778_v16  ;;  %v755_v20 = vunpack.c.l.bf16 %v778_v16  ;;  %v313_v26 = vld [vmem:[%s1135_s12] sm:$0x3] }
  0x18   : > { %837 = vmatprep.subr.mxu0 %v1067_v3  ;;  %v752_v21 = vunpack.c.h.bf16 %v777_v19  ;;  %v751_v23 = vunpack.c.l.bf16 %v777_v19  ;;  %v748_v24 = vunpack.c.h.bf16 %v746_v22  ;;  %v747_v25 = vunpack.c.l.bf16 %v746_v22 }
  0x19   : > { %838 = vmatpush3.msra.mxu0 %v775_v4 }
  0x1a   : > { %839 = vmatprep.subr.mxu0 %v1067_v3  ;;  %v312_v27 = vld [vmem:[#allocation2] sm:$0x3] }
  0x1b   : > { %840 = vmatpush3.msra.mxu0 %v772_v6 }
  0x1c   : > { %841 = vmatprep.subr.mxu0 %v1067_v3 }
  0x1d   : > { %842 = vmatpush3.msra.mxu0 %v771_v8 }
  0x1e   : > { %843 = vmatprep.subr.mxu0 %v1067_v3 }
  0x1f   : > { %844 = vmatpush3.msra.mxu0 %v768_v9 }
  0x20   : > { %845 = vmatprep.subr.mxu0 %v1067_v3 }
  0x21   : > { %846 = vmatpush3.msra.mxu0 %v767_v11 }
  0x22   : > { %847 = vmatprep.subr.mxu0 %v1067_v3 }
  0x23   : > { %848 = vmatpush3.msra.mxu0 %v764_v12 }
  0x24   : > { %849 = vmatprep.subr.mxu0 %v1067_v3 }
  0x25   : > { %850 = vmatpush3.msra.mxu0 %v763_v14 }
  0x26   : > { %851 = vmatprep.subr.mxu0 %v1067_v3 }
  0x27   : > { %852 = vmatpush3.msra.mxu0 %v760_v15 }
  0x28   : > { %853 = vmatprep.subr.mxu0 %v1067_v3 }
  0x29   : > { %854 = vmatpush3.msra.mxu0 %v759_v17 }
  0x2a   : > { %855 = vmatprep.subr.mxu0 %v1067_v3 }
  0x2b   : > { %856 = vmatpush3.msra.mxu0 %v756_v18 }
  0x2c   : > { %857 = vmatprep.subr.mxu0 %v1067_v3 }
  0x2d   : > { %858 = vmatpush3.msra.mxu0 %v755_v20 }
  0x2e   : > { %859 = vmatprep.subr.mxu0 %v1067_v3 }
  0x2f   : > { %860 = vmatpush3.msra.mxu0 %v752_v21 }
  0x30   : > { %861 = vmatprep.subr.mxu0 %v1067_v3 }
  0x31   : > { %862 = vmatpush3.msra.mxu0 %v751_v23 }
  0x32   : > { %863 = vmatprep.subr.mxu0 %v1067_v3 }
  0x33   : > { %864 = vmatpush3.msra.mxu0 %v748_v24 }
  0x34   : > { %865 = vmatprep.subr.mxu0 %v1067_v3 }
  0x35   : > { %866 = vmatpush3.msra.mxu0 %v747_v25 }
  0x36   : > { %868 = vmatmul.mubr.f32.vlgmr.msra.gmra.mxu0 %v313_v26 }
  0xf5   : > { %421 = sbr.rel (%p734_p6) target bundleno = 988 (0x3dc), region = 52 }
  0xf6   : > { %v412_v28 = vpop.f32.mrf.mxu0 }
  0xf7   : > { %v416_v29 = vadd.f32 %v412_v28, %v312_v27 }
  0xf8   : > { %v869_v30 = vpop.f32.mrf.mxu0 }
  0xf9   : > { %417 = vst [vmem:[#allocation2] sm:$0x3] %v416_v29 }
  0xfa   : > { %v439_v31 = vld [vmem:[%s1328_s2 + $0x78] sm:$0xff]  ;;  %v1069_v32 = vmov 0.0   ;;  %v438_v33 = vld [vmem:[%s1328_s2 + $0x70] sm:$0xff]  ;;  %vm1070_vm1 = vmmov 0   ;;  %v437_v34 = vld [vmem:[%s1328_s2 + $0x68] sm:$0xff]  ;;  %vm611_vm2 = vcmask 1041408  }
  0xfb   : > { %870 = vmatprep.subr.mxu0 %v1069_v32  ;;  %902 = vmatprep.mubr.msk.f32.mxu0 %vm1070_vm1, %v1069_v32  ;;  %v436_v35 = vld [vmem:[%s1328_s2 + $0x60] sm:$0xff]  ;;  %v532_v37 = vld [vmem:[%s1330_s4 + $0x78] sm:$0xff]  ;;  %v531_v38 = vld [vmem:[%s1330_s4 + $0x70] sm:$0xff] }
  0xfc   : > { %871 = vmatpush3.msra.mxu0 %v439_v31  ;;  %905 = vmatprep.subr.mxu1 %v1069_v32  ;;  %v435_v39 = vld [vmem:[%s1328_s2 + $0x58] sm:$0xff]  ;;  %v530_v40 = vld [vmem:[%s1330_s4 + $0x68] sm:$0xff]  ;;  %v434_v41 = vld [vmem:[%s1328_s2 + $0x50] sm:$0xff] }
  0xfd   : > { %872 = vmatprep.subr.mxu0 %v1069_v32  ;;  %937 = vmatprep.mubr.msk.f32.mxu1 %vm1070_vm1, %v1069_v32  ;;  %v529_v42 = vld [vmem:[%s1330_s4 + $0x60] sm:$0xff]  ;;  %v433_v43 = vld [vmem:[%s1328_s2 + $0x48] sm:$0xff]  ;;  %v528_v44 = vld [vmem:[%s1330_s4 + $0x58] sm:$0xff] }
  0xfe   : > { %873 = vmatpush3.msra.mxu0 %v438_v33  ;;  %906 = vmatpush3.msra.mxu1 %v532_v37  ;;  %v432_v45 = vld [vmem:[%s1328_s2 + $0x40] sm:$0xff]  ;;  %v527_v46 = vld [vmem:[%s1330_s4 + $0x50] sm:$0xff]  ;;  %v431_v47 = vld [vmem:[%s1328_s2 + $0x38] sm:$0xff] }
  0xff   : > { %874 = vmatprep.subr.mxu0 %v1069_v32  ;;  %907 = vmatprep.subr.mxu1 %v1069_v32  ;;  %v526_v48 = vld [vmem:[%s1330_s4 + $0x48] sm:$0xff]  ;;  %v430_v49 = vld [vmem:[%s1328_s2 + $0x30] sm:$0xff]  ;;  %v525_v50 = vld [vmem:[%s1330_s4 + $0x40] sm:$0xff] }
 0x100   : > { %v1171_v36 = vld [vmem:[#allocation2] sm:$0x3]  ;;  %875 = vmatpush3.msra.mxu0 %v437_v34  ;;  %908 = vmatpush3.msra.mxu1 %v531_v38  ;;  %v429_v51 = vld [vmem:[%s1328_s2 + $0x28] sm:$0xff]  ;;  %v524_v52 = vld [vmem:[%s1330_s4 + $0x38] sm:$0xff] }
 0x101   : > { %423 = vst [vmem:[#allocation3] sm:$0x3] %v1171_v36  ;;  %876 = vmatprep.subr.mxu0 %v1069_v32  ;;  %909 = vmatprep.subr.mxu1 %v1069_v32  ;;  %v428_v53 = vld [vmem:[%s1328_s2 + $0x20] sm:$0xff]  ;;  %v523_v54 = vld [vmem:[%s1330_s4 + $0x30] sm:$0xff]  ;;  %v427_v55 = vld [vmem:[%s1328_s2 + $0x18] sm:$0xff] }
 0x102   : > { %877 = vmatpush3.msra.mxu0 %v436_v35  ;;  %910 = vmatpush3.msra.mxu1 %v530_v40  ;;  %v522_v56 = vld [vmem:[%s1330_s4 + $0x28] sm:$0xff]  ;;  %v426_v57 = vld [vmem:[%s1328_s2 + $0x10] sm:$0xff]  ;;  %v521_v58 = vld [vmem:[%s1330_s4 + $0x20] sm:$0xff] }
 0x103   : > { %878 = vmatprep.subr.mxu0 %v1069_v32  ;;  %911 = vmatprep.subr.mxu1 %v1069_v32  ;;  %v425_v59 = vld [vmem:[%s1328_s2 + $0x8] sm:$0xff]  ;;  %v520_v60 = vld [vmem:[%s1330_s4 + $0x18] sm:$0xff]  ;;  %v424_v61 = vld [vmem:[%s1328_s2] sm:$0xff] }
 0x104   : > { %879 = vmatpush3.msra.mxu0 %v435_v39  ;;  %912 = vmatpush3.msra.mxu1 %v529_v42  ;;  %v519_v62 = vld [vmem:[%s1330_s4 + $0x10] sm:$0xff]  ;;  %v518_v63 = vld [vmem:[%s1330_s4 + $0x8] sm:$0xff]  ;;  %v517_v0 = vld [vmem:[%s1330_s4] sm:$0xff] }
 0x105   : > { %880 = vmatprep.subr.mxu0 %v1069_v32  ;;  %913 = vmatprep.subr.mxu1 %v1069_v32  ;;  %v735_v1 = vld [vmem:[%s1329_s3] ss:$0 sm:$0xff] }
 0x106   : > { %881 = vmatpush3.msra.mxu0 %v434_v41  ;;  %914 = vmatpush3.msra.mxu1 %v528_v44  ;;  %v736_v5 = vld [vmem:[%s1331_s5] ss:$0 sm:$0xff] }
 0x107   : > { %882 = vmatprep.subr.mxu0 %v1069_v32  ;;  %915 = vmatprep.subr.mxu1 %v1069_v32 }
 0x108   : > { %883 = vmatpush3.msra.mxu0 %v433_v43  ;;  %916 = vmatpush3.msra.mxu1 %v527_v46 }
 0x109   : > { %884 = vmatprep.subr.mxu0 %v1069_v32  ;;  %917 = vmatprep.subr.mxu1 %v1069_v32 }
 0x10a   : > { %885 = vmatpush3.msra.mxu0 %v432_v45  ;;  %918 = vmatpush3.msra.mxu1 %v526_v48 }
 0x10b   : > { %886 = vmatprep.subr.mxu0 %v1069_v32  ;;  %919 = vmatprep.subr.mxu1 %v1069_v32 }
 0x10c   : > { %887 = vmatpush3.msra.mxu0 %v431_v47  ;;  %920 = vmatpush3.msra.mxu1 %v525_v50 }
 0x10d   : > { %888 = vmatprep.subr.mxu0 %v1069_v32  ;;  %921 = vmatprep.subr.mxu1 %v1069_v32 }
 0x10e   : > { %889 = vmatpush3.msra.mxu0 %v430_v49  ;;  %922 = vmatpush3.msra.mxu1 %v524_v52 }
 0x10f   : > { %890 = vmatprep.subr.mxu0 %v1069_v32  ;;  %923 = vmatprep.subr.mxu1 %v1069_v32 }
 0x110   : > { %891 = vmatpush3.msra.mxu0 %v429_v51  ;;  %924 = vmatpush3.msra.mxu1 %v523_v54 }
 0x111   : > { %892 = vmatprep.subr.mxu0 %v1069_v32  ;;  %925 = vmatprep.subr.mxu1 %v1069_v32 }
 0x112   : > { %893 = vmatpush3.msra.mxu0 %v428_v53  ;;  %926 = vmatpush3.msra.mxu1 %v522_v56 }
 0x113   : > { %894 = vmatprep.subr.mxu0 %v1069_v32  ;;  %927 = vmatprep.subr.mxu1 %v1069_v32 }
 0x114   : > { %895 = vmatpush3.msra.mxu0 %v427_v55  ;;  %928 = vmatpush3.msra.mxu1 %v521_v58 }
 0x115   : > { %896 = vmatprep.subr.mxu0 %v1069_v32  ;;  %929 = vmatprep.subr.mxu1 %v1069_v32 }
 0x116   : > { %897 = vmatpush3.msra.mxu0 %v426_v57  ;;  %930 = vmatpush3.msra.mxu1 %v520_v60 }
 0x117   : > { %898 = vmatprep.subr.mxu0 %v1069_v32  ;;  %931 = vmatprep.subr.mxu1 %v1069_v32 }
 0x118   : > { %899 = vmatpush3.msra.mxu0 %v425_v59  ;;  %932 = vmatpush3.msra.mxu1 %v519_v62 }
 0x119   : > { %900 = vmatprep.subr.mxu0 %v1069_v32  ;;  %933 = vmatprep.subr.mxu1 %v1069_v32 }
 0x11a   : > { %901 = vmatpush3.msra.mxu0 %v424_v61  ;;  %934 = vmatpush3.msra.mxu1 %v518_v63 }
 0x11b   : > { %903 = vmatmul.mubr.f32.vlgmr.msra.gmra.mxu0 %v1171_v36  ;;  %935 = vmatprep.subr.mxu1 %v1069_v32 }
 0x11c   : > { %936 = vmatpush3.msra.mxu1 %v517_v0 }
 0x1db   : > { %v513_v2 = vpop.f32.mrf.mxu0 }
 0x1dc   : > { %v514_v3 = vadd.f32 %v735_v1, %v513_v2 }
 0x1dd   : > { %v904_v4 = vpop.f32.mrf.mxu0 }
 0x1de   : > { %938 = vmatmul.mubr.f32.vlgmr.msra.gmra.mxu1 %v514_v3 }
 0x29e   : > { %v606_v6 = vpop.f32.mrf.mxu1 }
 0x29f   : > { %v607_v7 = vadd.f32 %v736_v5, %v606_v6 }
 0x2a0   : > { %v939_v8 = vpop.f32.mrf.mxu1 }
 0x2a1   : > { %610 = vst [vmem:[#allocation7] sm:$0x3] %v607_v7  ;;  %v612_v9 = vsel %vm611_vm2, %v607_v7, -inf }
 0x2a2   : > { %613 = vmax.xlane.f32.xlu0 %v612_v9 }
 0x32b   : > { %v614_v10 = vpop.xlane.xlu0 %613 }
 0x32c   : > { %v615_v11 = vsub.f32 %v607_v7, %v614_v10 }
 0x32e   : > { %v616_v12 = vmul.f32 1.442695, %v615_v11 }
 0x330   : > { %974 = vpow2.f32 %v616_v12 }
 0x33d   : > { %v975_v13 = vpop.eup %974 }
 0x33e   : > { %v618_v14 = vsel %vm611_vm2, %v975_v13, 0.0 }
 0x33f   : > { %619 = vadd.xlane.f32.xlu0 %v618_v14 }
 0x3c8   : > { %v620_v15 = vpop.xlane.xlu0 %619 }
 0x3c9   : > { %976 = vlog2.f32 %v620_v15 }
 0x3d6   : > { %v977_v16 = vpop.eup %976 }
 0x3d7   : > { %v622_v17 = vmul.f32 0.6931472, %v977_v16 }
 0x3d9   : > { %v623_v18 = vsub.f32 %v615_v11, %v622_v17 }
 0x3db   : > { %624 = vst [vmem:[#allocation5] sm:$0x3] %v623_v18 }
 0x3dc PF: > { %p952_p7 = scmp.eq.s32.totalorder %s1125_s28, 1  ;;  %s1071_s25 = smov [#allocation5]  }
 0x3dd   : > { %s643_s26 = sshll.u32 %s1071_s25, 4  ;;  %s1072_s29 = smov [#allocation3]   ;;  %s644_s26 = int_to_ptr.vmem [resolvable:$true] %s643_s26 }
 0x3de   : > { %s632_s30 = sshll.u32 %s1072_s29, 4  ;;  %s978_s9 = scalar_lea.vmem %s644_s26, 32  ;;  %s633_s30 = int_to_ptr.vmem [resolvable:$true] %s632_s30 }
 0x3df   : > { %p979_p8 = scmp.ne.s32.totalorder %s644_s26, %s978_s9  ;;  %p985_p11 = scmp.lt.s32.totalorder %s644_s26, %s644_s26 }
 0x3e0   : > { %p986_p12 = scmp.lt.s32.totalorder %s978_s9, %s978_s9 }
 0x3e1   : > { %p980_p9 = pnand %p979_p8, %p952_p7 }
 0x3e2   : > { %p987_p13 = por %p986_p12, %p985_p11 }
 0x3e3   : > { %p981_p10 = pneg %p980_p9 }
 0x3e5   : > { %p988_p0 = pnand %p987_p13, %p981_p10 }
 0x3e7   : > { %991 = shalt.err (!%p988_p0)
}
 0x3e8   : > { %943 = dma.vmem_to_hbm [thread:$0]  (%p952_p7), %s644_s26, 32, %s1333_s7, [#allocation6]  }
 0x3e9   : > { %s1002_s12 = scalar_lea.vmem %s633_s30, 32  ;;  %p1009_p4 = scmp.lt.s32.totalorder %s633_s30, %s633_s30 }
 0x3ea   : > { %p1003_p1 = scmp.ne.s32.totalorder %s633_s30, %s1002_s12  ;;  %p1010_p5 = scmp.lt.s32.totalorder %s1002_s12, %s1002_s12 }
 0x3ec   : > { %p1004_p2 = pnand %p1003_p1, %p952_p7  ;;  %p1011_p6 = por %p1010_p5, %p1009_p4 }
 0x3ee   : > { %p1005_p3 = pneg %p1004_p2 }
 0x3f0   : > { %p1012_p8 = pnand %p1011_p6, %p1005_p3 }
 0x3f2   : > { %1015 = shalt.err (!%p1012_p8)
}
 0x3f3   : > { %941 = dma.vmem_to_hbm [thread:$0]  (%p952_p7), %s633_s30, 32, %s1332_s6, [#allocation4]  }
 0x3f4   : > { %s1073_s15 = smov [#allocation7]  }
 0x3f5   : > { %s654_s16 = sshll.u32 %s1073_s15, 4  ;;  %s655_s16 = int_to_ptr.vmem [resolvable:$true] %s654_s16 }
 0x3f6   : > { %s1026_s17 = scalar_lea.vmem %s655_s16, 32  ;;  %p1033_p12 = scmp.lt.s32.totalorder %s655_s16, %s655_s16 }
 0x3f7   : > { %p1027_p9 = scmp.ne.s32.totalorder %s655_s16, %s1026_s17  ;;  %p1034_p13 = scmp.lt.s32.totalorder %s1026_s17, %s1026_s17 }
 0x3f9   : > { %p1028_p10 = pnand %p1027_p9, %p952_p7  ;;  %p1035_p0 = por %p1034_p13, %p1033_p12 }
 0x3fb   : > { %p1029_p11 = pneg %p1028_p10 }
 0x3fd   : > { %p1036_p1 = pnand %p1035_p0, %p1029_p11 }
 0x3ff   : > { %1039 = shalt.err (!%p1036_p1)
}
 0x400   : > { %945 = dma.vmem_to_hbm [thread:$0]  (%p952_p7), %s655_s16, 32, %s1334_s8, [#allocation6]  }
 0x401   : > { %1055 = dma.done.wait (%p952_p7), [#allocation4], 32  }
 0x402   : > { %1057 = vsyncadd (%p952_p7), [#allocation4], 4294967264 }
 0x403   : > { %1059 = dma.done.wait (%p952_p7), [#allocation6], 64  }
 0x404   : > { %1061 = vsyncadd (%p952_p7), [#allocation6], 4294967232 }
 0x405 PF: > { %s21_s27 = sadd.s32 1, %s1064_s27  }
 0x406   : > { %p18_p2 = scmp.ge.s32.totalorder %s21_s27, 4  }
 0x408   :  { %20 = sbr.rel (!%p18_p2) target bundleno = 2 (0x2), region = 98 }
 0x40d   :  { %675 = vsyncpa [#allocation4], 1 }
 0x40e   :  { %677 = vsyncpa [#allocation4 + $0x1], 1 }
 0x40f   :  { %678 = vsyncpa [#allocation6], 1 }

// kernel: gnn_stack_forward.4
= control target key start
LH: loop header
LB: loop body
LE: loop exit
PB: predicated region body
PF: predicated region fallthrough
CT: control target
= control target key end

     0   :  { %s1852_s27 = smov 0   ;;  %s1854_s28 = smov 0   ;;  %s2156_s0 = inlined_call_operand.vmem [shape: bf16[256,256], index: 0, kind: input, shape index: {}]   ;;  %s2157_s1 = inlined_call_operand.vmem [shape: bf16[256,128], index: 1, kind: input, shape index: {}]   ;;  %s2158_s2 = inlined_call_operand.vmem [shape: f32[128,128], index: 2, kind: input, shape index: {}]   ;;  %s2159_s3 = inlined_call_operand.vmem [shape: f32[1,128], index: 3, kind: input, shape index: {}]   ;;  %s2160_s4 = inlined_call_operand.vmem [shape: f32[128,128], index: 4, kind: input, shape index: {}]   ;;  %s2161_s5 = inlined_call_operand.vmem [shape: f32[1,128], index: 5, kind: input, shape index: {}]   ;;  %s2162_s6 = inlined_call_operand.vmem [shape: f32[1,128], index: 6, kind: input, shape index: {}]   ;;  %s2163_s7 = inlined_call_operand.vmem [shape: f32[1,128], index: 7, kind: input, shape index: {}]   ;;  %s2164_s8 = inlined_call_operand.vmem [shape: bf16[256,128], index: 8, kind: output, shape index: {}]  }
   0x1   :  { %s1856_s29 = smov 0   ;;  %s1858_s30 = smov 0  }
   0x2   :  { %s1860_s9 = smov 0   ;;  %s1862_s10 = smov 0  }
   0x3   :  { %s1864_s11 = smov 0  }
   0x4 LB: > { %s27_s12 = sadd.s32 1, %s1796_s9  ;;  %s30_s13 = sadd.s32 1, %s1800_s10  ;;  %s1804_s11 = sphi %s1864_s11, %s18_s11   ;;  %s1800_s10 = sphi %s1862_s10, %s2170_s10   ;;  %s1796_s9 = sphi %s1860_s9, %s2169_s9   ;;  %s1792_s30 = sphi %s1858_s30, %s2168_s30   ;;  %s1788_s29 = sphi %s1856_s29, %s2167_s29   ;;  %s1784_s28 = sphi %s1854_s28, %s2166_s28   ;;  %s1780_s27 = sphi %s1852_s27, %s2165_s27  }
   0x5   : > { %p28_p0 = scmp.ge.s32.totalorder %s27_s12, 2  ;;  %p46_p1 = scmp.ne.s32.totalorder %s1784_s28, %s1780_s27 }
   0x6   : > { %p47_p2 = scmp.eq.s32.totalorder %s1804_s11, 0  ;;  %s39_s17 = sadd.s32 1, %s1784_s28 }
   0x7   : > { %s2172_s12 = smov (%p28_p0, %s27_s12), 0  ;;  %s2174_s13 = smov (!%p28_p0, %s30_s13), %s1800_s10 }
   0x8   : > { %p48_p3 = por %p47_p2, %p46_p1  ;;  %p32_p4 = scmp.ge.s32.totalorder %s2174_s13, 2 }
   0x9   : > { %s35_s14 = ssub.s32 %s1796_s9, %s2172_s12  ;;  %p1322_p6 = scmp.ge.s32.totalorder %s1804_s11, 4 }
   0xa   : > { %s2176_s13 = smov (%p32_p4, %s2174_s13), 0 }
   0xb   : > { %s34_s15 = ssub.s32 %s1800_s10, %s2176_s13  ;;  %266 = sbr.rel (%p1322_p6) target bundleno = 32 (0x20), region = 44 }
   0xc   : > { %s36_s16 = sor.u32 %s35_s14, %s34_s15 }
   0xd   : > { %p37_p5 = scmp.eq.s32.totalorder %s36_s16, 0 }
   0xf   : > { %s1903_s18 = scalar_select %p37_p5, %s1784_s28, %s39_s17  }
  0x10   : > { %269 = sbr.rel (!%p48_p3) target bundleno = 32 (0x20), region = 48  ;;  %s271_s19 = sand.u32 (%p48_p3), 1, %s1784_s28  }
  0x11   : > { %s1373_s20 = sshll.u32 (%p48_p3), %s1800_s10, 5  ;;  %s1323_s21 = sshll.u32 (%p48_p3), %s271_s19, 6 }
  0x12   : > { %s276_s22 = sadd.s32 (%p48_p3), %s1796_s9, %s1373_s20  ;;  %s273_s14 = scalar_lea.vmem (%p48_p3), [#allocation3], %s1323_s21 }
  0x13   : > { %s1326_s23 = sshll.u32 (%p48_p3), %s276_s22, 2 }
  0x14   : > { %s1912_s26 = scalar_lea.vmem (%p48_p3), %s2156_s0, %s1326_s23 }
  0x15   : > { %v295_v0 = vld [vmem:[%s1912_s26] sm:$0xf]  ;;  %v297_v1 = vld [vmem:[%s1912_s26 + $0x8] sm:$0xf]  ;;  %v299_v2 = vld [vmem:[%s1912_s26 + $0x10] sm:$0xf] }
  0x16   : > { %296 = vst [vmem:[%s273_s14] sm:$0xf] %v295_v0  ;;  %298 = vst [vmem:[%s273_s14 + $0x4] sm:$0xf] %v297_v1  ;;  %v301_v3 = vld [vmem:[%s1912_s26 + $0x18] sm:$0xf] }
  0x17   : > { %300 = vst [vmem:[%s273_s14 + $0x8] sm:$0xf] %v299_v2  ;;  %v303_v4 = vld [vmem:[%s1912_s26 + $0x20] sm:$0xf]  ;;  %v305_v5 = vld [vmem:[%s1912_s26 + $0x28] sm:$0xf] }
  0x18   : > { %302 = vst [vmem:[%s273_s14 + $0xc] sm:$0xf] %v301_v3  ;;  %304 = vst [vmem:[%s273_s14 + $0x10] sm:$0xf] %v303_v4  ;;  %v307_v6 = vld [vmem:[%s1912_s26 + $0x30] sm:$0xf] }
  0x19   : > { %306 = vst [vmem:[%s273_s14 + $0x14] sm:$0xf] %v305_v5  ;;  %v309_v7 = vld [vmem:[%s1912_s26 + $0x38] sm:$0xf]  ;;  %v311_v8 = vld [vmem:[%s1912_s26 + $0x40] sm:$0xf] }
  0x1a   : > { %308 = vst [vmem:[%s273_s14 + $0x18] sm:$0xf] %v307_v6  ;;  %310 = vst [vmem:[%s273_s14 + $0x1c] sm:$0xf] %v309_v7  ;;  %v313_v9 = vld [vmem:[%s1912_s26 + $0x48] sm:$0xf] }
  0x1b   : > { %312 = vst [vmem:[%s273_s14 + $0x20] sm:$0xf] %v311_v8  ;;  %v315_v10 = vld [vmem:[%s1912_s26 + $0x50] sm:$0xf]  ;;  %v317_v11 = vld [vmem:[%s1912_s26 + $0x58] sm:$0xf] }
  0x1c   : > { %314 = vst [vmem:[%s273_s14 + $0x24] sm:$0xf] %v313_v9  ;;  %316 = vst [vmem:[%s273_s14 + $0x28] sm:$0xf] %v315_v10  ;;  %v319_v12 = vld [vmem:[%s1912_s26 + $0x60] sm:$0xf] }
  0x1d   : > { %318 = vst [vmem:[%s273_s14 + $0x2c] sm:$0xf] %v317_v11  ;;  %v321_v13 = vld [vmem:[%s1912_s26 + $0x68] sm:$0xf]  ;;  %v323_v14 = vld [vmem:[%s1912_s26 + $0x70] sm:$0xf] }
  0x1e   : > { %320 = vst [vmem:[%s273_s14 + $0x30] sm:$0xf] %v319_v12  ;;  %322 = vst [vmem:[%s273_s14 + $0x34] sm:$0xf] %v321_v13  ;;  %v325_v15 = vld [vmem:[%s1912_s26 + $0x78] sm:$0xf] }
  0x1f   : > { %324 = vst [vmem:[%s273_s14 + $0x38] sm:$0xf] %v323_v14  ;;  %326 = vst [vmem:[%s273_s14 + $0x3c] sm:$0xf] %v325_v15 }
  0x20 PF: > { %p1327_p7 = scmp.ge.s32.totalorder %s1804_s11, 1  ;;  %p381_p8 = scmp.lt.s32.totalorder %s1804_s11, 5 }
  0x22   : > { %p382_p9 = pnand %p1327_p7, %p381_p8 }
  0x23   : > { %s388_s15 = sand.u32 (!%p382_p9), 1, %s1780_s27   ;;  %s1329_s16 = sshll.u32 (!%p382_p9), %s1792_s30, 4 }
  0x24   : > { %385 = sbr.rel (%p382_p9) target bundleno = 769 (0x301), region = 89  ;;  %s1328_s17 = sshll.u32 (!%p382_p9), %s388_s15, 6 }
  0x25   : > { %p423_p10 = scmp.lt.s32.totalorder (!%p382_p9), %s1329_s16, 31  ;;  %s1939_s23 = scalar_lea.vmem (!%p382_p9), [#allocation3], %s1328_s17 }
  0x26   : > { %p1331_p11 = scmp.ne.s32.totalorder (!%p382_p9), %s1788_s29, 0 }
  0x29   : > { %s2178_s16 = smov (!%p423_p10, %s1329_s16), 31  ;;  %432 = sbr.rel (%p1331_p11) target bundleno = 55 (0x37), region = 97 }
  0x2a   : > { %s1330_s19 = sshll.u32 %s2178_s16, 2 }
  0x2b   : > { %s1937_s22 = scalar_lea.vmem %s2164_s8, %s1330_s19 }
  0x2e   : > { %v1806_v16 = vmov 0.0  }
  0x2f   : > { %433 = vst [vmem:[#allocation2 + $0x30] sm:$0xff] %v1806_v16  ;;  %434 = vst [vmem:[#allocation2] sm:$0xff] %v1806_v16 }
  0x30   : > { %435 = vst [vmem:[#allocation2 + $0x58] sm:$0xff] %v1806_v16  ;;  %436 = vst [vmem:[#allocation2 + $0x18] sm:$0xff] %v1806_v16 }
  0x31   : > { %437 = vst [vmem:[#allocation2 + $0x50] sm:$0xff] %v1806_v16  ;;  %438 = vst [vmem:[#allocation2 + $0x68] sm:$0xff] %v1806_v16 }
  0x32   : > { %439 = vst [vmem:[#allocation2 + $0x8] sm:$0xff] %v1806_v16  ;;  %440 = vst [vmem:[#allocation2 + $0x48] sm:$0xff] %v1806_v16 }
  0x33   : > { %441 = vst [vmem:[#allocation2 + $0x40] sm:$0xff] %v1806_v16  ;;  %442 = vst [vmem:[#allocation2 + $0x20] sm:$0xff] %v1806_v16 }
  0x34   : > { %443 = vst [vmem:[#allocation2 + $0x10] sm:$0xff] %v1806_v16  ;;  %444 = vst [vmem:[#allocation2 + $0x38] sm:$0xff] %v1806_v16 }
  0x35   : > { %445 = vst [vmem:[#allocation2 + $0x60] sm:$0xff] %v1806_v16  ;;  %446 = vst [vmem:[#allocation2 + $0x70] sm:$0xff] %v1806_v16 }
  0x36   : > { %447 = vst [vmem:[#allocation2 + $0x78] sm:$0xff] %v1806_v16  ;;  %448 = vst [vmem:[#allocation2 + $0x28] sm:$0xff] %v1806_v16 }
  0x37 PF: > { %s1332_s27 = sshll.u32 %s1788_s29, 7  ;;  %v1742_v17 = vld [vmem:[%s1939_s23] sm:$0xff]   ;;  %v1744_v27 = vld [vmem:[%s1939_s23 + $0x8] sm:$0xff]   ;;  %v1746_v29 = vld [vmem:[%s1939_s23 + $0x10] sm:$0xff]   ;;  %p1350_p12 = scmp.ne.s32.totalorder %s1788_s29, 1 }
  0x38   : > { %s450_s30 = sshra.s32 %s1332_s27, 3  ;;  %v1743_v18 = vld [vmem:[%s1939_s23 + $0x20] sm:$0xff]   ;;  %1533 = vmatprep.mubr.bf16.mxu0 %v1742_v17  ;;  %v1745_v28 = vld [vmem:[%s1939_s23 + $0x28] sm:$0xff]   ;;  %v1747_v30 = vld [vmem:[%s1939_s23 + $0x30] sm:$0xff]  }
  0x39   : > { %s1333_s24 = sshll.u32 %s450_s30, 2  ;;  %1541 = vmatprep.mubr.bf16.mxu1 %v1743_v18  ;;  %v1748_v31 = vld [vmem:[%s1939_s23 + $0x18] sm:$0xff]   ;;  %v470_v37 = vld [vmem:[#allocation2 + $0x30] sm:$0xff]  ;;  %v471_v49 = vld [vmem:[#allocation2] sm:$0xff] }
  0x3a   : > { %s1948_s14 = scalar_lea.vmem %s2157_s1, %s1333_s24  ;;  %v1749_v32 = vld [vmem:[%s1939_s23 + $0x38] sm:$0xff]   ;;  %v478_v38 = vld [vmem:[#allocation2 + $0x40] sm:$0xff]  ;;  %v476_v55 = vld [vmem:[#allocation2 + $0x8] sm:$0xff] }
  0x3b   : > { %v1734_v19 = vld [vmem:[%s1948_s14 + $0x38] sm:$0xff]   ;;  %v1735_v20 = vld [vmem:[%s1948_s14 + $0x30] sm:$0xff]   ;;  %v1736_v21 = vld [vmem:[%s1948_s14 + $0x28] sm:$0xff]  }
  0x3c   : > { %1517 = vmatprep.subr.bf16.mxu0 %v1734_v19  ;;  %1661 = vmatprep.subr.bf16.mxu1 %v1734_v19  ;;  %v1737_v22 = vld [vmem:[%s1948_s14 + $0x20] sm:$0xff]   ;;  %v1738_v23 = vld [vmem:[%s1948_s14 + $0x18] sm:$0xff]   ;;  %v1739_v24 = vld [vmem:[%s1948_s14 + $0x10] sm:$0xff]  }
  0x3d   : > { %1518 = vmatpush3.bf16.msra.mxu0 %v1734_v19  ;;  %1669 = vmatpush3.bf16.msra.mxu1 %v1734_v19  ;;  %v1740_v25 = vld [vmem:[%s1948_s14 + $0x8] sm:$0xff]   ;;  %v1741_v26 = vld [vmem:[%s1948_s14] sm:$0xff]   ;;  %v472_v33 = vld [vmem:[#allocation2 + $0x58] sm:$0xff] }
  0x3e   : > { %1519 = vmatprep.subr.bf16.mxu0 %v1735_v20  ;;  %1662 = vmatprep.subr.bf16.mxu1 %v1735_v20  ;;  %v480_v34 = vld [vmem:[#allocation2 + $0x10] sm:$0xff]  ;;  %v473_v43 = vld [vmem:[#allocation2 + $0x18] sm:$0xff]  ;;  %v479_v50 = vld [vmem:[#allocation2 + $0x20] sm:$0xff] }
  0x3f   : > { %v481_v44 = vld [vmem:[#allocation2 + $0x38] sm:$0xff]  ;;  %v474_v61 = vld [vmem:[#allocation2 + $0x50] sm:$0xff]  ;;  %v482_v62 = vld [vmem:[#allocation2 + $0x60] sm:$0xff] }
  0x40   : > { %v484_v56 = vld [vmem:[#allocation2 + $0x78] sm:$0xff]  ;;  %v477_v3 = vld [vmem:[#allocation2 + $0x48] sm:$0xff]  ;;  %v483_v10 = vld [vmem:[#allocation2 + $0x70] sm:$0xff] }
  0x41   : > { %1520 = vmatpush3.bf16.msra.mxu0 %v1735_v20  ;;  %1670 = vmatpush3.bf16.msra.mxu1 %v1735_v20  ;;  %v485_v4 = vld [vmem:[#allocation2 + $0x28] sm:$0xff] }
  0x42   : > { %1521 = vmatprep.subr.bf16.mxu0 %v1736_v21  ;;  %1663 = vmatprep.subr.bf16.mxu1 %v1736_v21  ;;  %v475_v9 = vld [vmem:[#allocation2 + $0x68] sm:$0xff] }
  0x45   : > { %1522 = vmatpush3.bf16.msra.mxu0 %v1736_v21  ;;  %1671 = vmatpush3.bf16.msra.mxu1 %v1736_v21 }
  0x46   : > { %1523 = vmatprep.subr.bf16.mxu0 %v1737_v22  ;;  %1664 = vmatprep.subr.bf16.mxu1 %v1737_v22 }
  0x49   : > { %1524 = vmatpush3.bf16.msra.mxu0 %v1737_v22  ;;  %1672 = vmatpush3.bf16.msra.mxu1 %v1737_v22 }
  0x4a   : > { %1525 = vmatprep.subr.bf16.mxu0 %v1738_v23  ;;  %1665 = vmatprep.subr.bf16.mxu1 %v1738_v23 }
  0x4d   : > { %1526 = vmatpush3.bf16.msra.mxu0 %v1738_v23  ;;  %1673 = vmatpush3.bf16.msra.mxu1 %v1738_v23 }
  0x4e   : > { %1527 = vmatprep.subr.bf16.mxu0 %v1739_v24  ;;  %1666 = vmatprep.subr.bf16.mxu1 %v1739_v24 }
  0x51   : > { %1528 = vmatpush3.bf16.msra.mxu0 %v1739_v24  ;;  %1674 = vmatpush3.bf16.msra.mxu1 %v1739_v24 }
  0x52   : > { %1529 = vmatprep.subr.bf16.mxu0 %v1740_v25  ;;  %1667 = vmatprep.subr.bf16.mxu1 %v1740_v25 }
  0x55   : > { %1530 = vmatpush3.bf16.msra.mxu0 %v1740_v25  ;;  %1675 = vmatpush3.bf16.msra.mxu1 %v1740_v25 }
  0x56   : > { %1531 = vmatprep.subr.bf16.mxu0 %v1741_v26  ;;  %1668 = vmatprep.subr.bf16.mxu1 %v1741_v26 }
  0x59   : > { %1532 = vmatpush3.bf16.msra.mxu0 %v1741_v26  ;;  %1676 = vmatpush3.bf16.msra.mxu1 %v1741_v26 }
  0x5c   : > { %1534 = vmatmul.mubr.bf16.vlgmr.msra.gmra.mxu0 %v1744_v27  ;;  %1542 = vmatmul.mubr.bf16.vlgmr.msra.gmra.mxu1 %v1745_v28 }
  0x5d   : > { %1537 = vmatprep.mubr.bf16.mxu0 %v1746_v29  ;;  %1545 = vmatprep.mubr.bf16.mxu1 %v1747_v30 }
  0x64   : > { %1538 = vmatmul.mubr.bf16.gmra.mxu0 %v1748_v31  ;;  %1546 = vmatmul.mubr.bf16.gmra.mxu1 %v1749_v32 }
 0x11c   : > { %v1535_v35 = vpop.f32.mrf.mxu0  ;;  %v1543_v36 = vpop.f32.mrf.mxu1 }
 0x11d   : > { %v697_v39 = vadd.f32 %v1535_v35, %v472_v33  ;;  %v705_v40 = vadd.f32 %v1543_v36, %v480_v34 }
 0x11e   : > { %v632_v41 = vpop.f32.mrf.mxu0  ;;  %v664_v42 = vpop.f32.mrf.mxu1 }
 0x11f   : > { %713 = vst [vmem:[#allocation2 + $0x58] sm:$0xff] %v697_v39  ;;  %721 = vst [vmem:[#allocation2 + $0x10] sm:$0xff] %v705_v40  ;;  %v695_v45 = vadd.f32 %v632_v41, %v470_v37  ;;  %v703_v46 = vadd.f32 %v664_v42, %v478_v38 }
 0x120   : > { %v1536_v47 = vpop.f32.mrf.mxu0  ;;  %v1544_v48 = vpop.f32.mrf.mxu1 }
 0x121   : > { %711 = vst [vmem:[#allocation2 + $0x30] sm:$0xff] %v695_v45  ;;  %719 = vst [vmem:[#allocation2 + $0x40] sm:$0xff] %v703_v46  ;;  %v698_v51 = vadd.f32 %v1536_v47, %v473_v43  ;;  %v706_v52 = vadd.f32 %v1544_v48, %v481_v44 }
 0x122   : > { %v635_v53 = vpop.f32.mrf.mxu0  ;;  %v667_v54 = vpop.f32.mrf.mxu1 }
 0x123   : > { %714 = vst [vmem:[#allocation2 + $0x18] sm:$0xff] %v698_v51  ;;  %722 = vst [vmem:[#allocation2 + $0x38] sm:$0xff] %v706_v52  ;;  %v696_v57 = vadd.f32 %v635_v53, %v471_v49  ;;  %v704_v58 = vadd.f32 %v667_v54, %v479_v50 }
 0x124   : > { %v1539_v59 = vpop.f32.mrf.mxu0  ;;  %v1547_v60 = vpop.f32.mrf.mxu1 }
 0x125   : > { %712 = vst [vmem:[#allocation2] sm:$0xff] %v696_v57  ;;  %720 = vst [vmem:[#allocation2 + $0x20] sm:$0xff] %v704_v58  ;;  %v701_v63 = vadd.f32 %v1539_v59, %v476_v55  ;;  %v709_v0 = vadd.f32 %v1547_v60, %v484_v56 }
 0x126   : > { %v648_v1 = vpop.f32.mrf.mxu0  ;;  %v680_v2 = vpop.f32.mrf.mxu1 }
 0x127   : > { %717 = vst [vmem:[#allocation2 + $0x8] sm:$0xff] %v701_v63  ;;  %725 = vst [vmem:[#allocation2 + $0x78] sm:$0xff] %v709_v0  ;;  %v699_v5 = vadd.f32 %v648_v1, %v474_v61  ;;  %v707_v6 = vadd.f32 %v680_v2, %v482_v62 }
 0x128   : > { %v1540_v7 = vpop.f32.mrf.mxu0  ;;  %v1548_v8 = vpop.f32.mrf.mxu1 }
 0x129   : > { %715 = vst [vmem:[#allocation2 + $0x50] sm:$0xff] %v699_v5  ;;  %723 = vst [vmem:[#allocation2 + $0x60] sm:$0xff] %v707_v6  ;;  %v702_v11 = vadd.f32 %v1540_v7, %v477_v3  ;;  %v710_v12 = vadd.f32 %v1548_v8, %v485_v4  ;;  %730 = sbr.rel (%p1350_p12) target bundleno = 769 (0x301), region = 101 }
 0x12a   : > { %v651_v13 = vpop.f32.mrf.mxu0  ;;  %v683_v14 = vpop.f32.mrf.mxu1 }
 0x12b   : > { %718 = vst [vmem:[#allocation2 + $0x48] sm:$0xff] %v702_v11  ;;  %726 = vst [vmem:[#allocation2 + $0x28] sm:$0xff] %v710_v12  ;;  %v700_v15 = vadd.f32 %v651_v13, %v475_v9  ;;  %v708_v16 = vadd.f32 %v683_v14, %v483_v10 }
 0x12d   : > { %716 = vst [vmem:[#allocation2 + $0x68] sm:$0xff] %v700_v15  ;;  %724 = vst [vmem:[#allocation2 + $0x70] sm:$0xff] %v708_v16 }
 0x12e   : > { %v762_v17 = vld [vmem:[%s2158_s2 + $0x78] sm:$0xff]  ;;  %v761_v18 = vld [vmem:[%s2158_s2 + $0x70] sm:$0xff]  ;;  %v760_v19 = vld [vmem:[%s2158_s2 + $0x68] sm:$0xff] }
 0x12f   : > { %1549 = vmatprep.subr.mxu0 %v762_v17  ;;  %v759_v20 = vld [vmem:[%s2158_s2 + $0x60] sm:$0xff]  ;;  %v731_v21 = vld [vmem:[#allocation2 + $0x30] sm:$0xff]  ;;  %v758_v22 = vld [vmem:[%s2158_s2 + $0x58] sm:$0xff] }
 0x130   : > { %1550 = vmatpush3.msra.mxu0 %v762_v17  ;;  %1581 = vmatprep.mubr.f32.mxu0 %v731_v21  ;;  %v757_v23 = vld [vmem:[%s2158_s2 + $0x50] sm:$0xff]  ;;  %v756_v24 = vld [vmem:[%s2158_s2 + $0x48] sm:$0xff]  ;;  %v946_v25 = vld [vmem:[%s2160_s4 + $0x78] sm:$0xff] }
 0x131   : > { %1551 = vmatprep.subr.mxu0 %v761_v18  ;;  %1605 = vmatprep.subr.mxu1 %v946_v25  ;;  %v945_v26 = vld [vmem:[%s2160_s4 + $0x70] sm:$0xff]  ;;  %v755_v27 = vld [vmem:[%s2158_s2 + $0x40] sm:$0xff]  ;;  %v944_v28 = vld [vmem:[%s2160_s4 + $0x68] sm:$0xff] }
 0x132   : > { %1552 = vmatpush3.msra.mxu0 %v761_v18  ;;  %1606 = vmatpush3.msra.mxu1 %v946_v25  ;;  %v754_v29 = vld [vmem:[%s2158_s2 + $0x38] sm:$0xff]  ;;  %v943_v30 = vld [vmem:[%s2160_s4 + $0x60] sm:$0xff]  ;;  %v753_v31 = vld [vmem:[%s2158_s2 + $0x30] sm:$0xff] }
 0x133   : > { %1553 = vmatprep.subr.mxu0 %v760_v19  ;;  %1607 = vmatprep.subr.mxu1 %v945_v26  ;;  %v942_v32 = vld [vmem:[%s2160_s4 + $0x58] sm:$0xff]  ;;  %v752_v33 = vld [vmem:[%s2158_s2 + $0x28] sm:$0xff]  ;;  %v941_v34 = vld [vmem:[%s2160_s4 + $0x50] sm:$0xff] }
 0x134   : > { %1554 = vmatpush3.msra.mxu0 %v760_v19  ;;  %1608 = vmatpush3.msra.mxu1 %v945_v26  ;;  %v751_v35 = vld [vmem:[%s2158_s2 + $0x20] sm:$0xff]  ;;  %v940_v36 = vld [vmem:[%s2160_s4 + $0x48] sm:$0xff]  ;;  %v750_v37 = vld [vmem:[%s2158_s2 + $0x18] sm:$0xff] }
 0x135   : > { %1555 = vmatprep.subr.mxu0 %v759_v20  ;;  %1609 = vmatprep.subr.mxu1 %v944_v28  ;;  %v939_v38 = vld [vmem:[%s2160_s4 + $0x40] sm:$0xff]  ;;  %v749_v39 = vld [vmem:[%s2158_s2 + $0x10] sm:$0xff]  ;;  %v938_v40 = vld [vmem:[%s2160_s4 + $0x38] sm:$0xff] }
 0x136   : > { %1556 = vmatpush3.msra.mxu0 %v759_v20  ;;  %1610 = vmatpush3.msra.mxu1 %v944_v28  ;;  %v748_v41 = vld [vmem:[%s2158_s2 + $0x8] sm:$0xff]  ;;  %v937_v42 = vld [vmem:[%s2160_s4 + $0x30] sm:$0xff]  ;;  %v747_v43 = vld [vmem:[%s2158_s2] sm:$0xff] }
 0x137   : > { %1557 = vmatprep.subr.mxu0 %v758_v22  ;;  %1611 = vmatprep.subr.mxu1 %v943_v30  ;;  %v936_v44 = vld [vmem:[%s2160_s4 + $0x28] sm:$0xff]  ;;  %v732_v45 = vld [vmem:[#allocation2] sm:$0xff]  ;;  %v733_v47 = vld [vmem:[#allocation2 + $0x58] sm:$0xff] }
 0x138   : > { %1558 = vmatpush3.msra.mxu0 %v758_v22  ;;  %1612 = vmatpush3.msra.mxu1 %v943_v30  ;;  %v935_v46 = vld [vmem:[%s2160_s4 + $0x20] sm:$0xff]  ;;  %v734_v48 = vld [vmem:[#allocation2 + $0x18] sm:$0xff]  ;;  %v735_v49 = vld [vmem:[#allocation2 + $0x50] sm:$0xff] }
 0x139   : > { %1559 = vmatprep.subr.mxu0 %v757_v23  ;;  %1613 = vmatprep.subr.mxu1 %v942_v32  ;;  %v736_v50 = vld [vmem:[#allocation2 + $0x68] sm:$0xff]  ;;  %v739_v53 = vld [vmem:[#allocation2 + $0x40] sm:$0xff]  ;;  %v741_v55 = vld [vmem:[#allocation2 + $0x10] sm:$0xff] }
 0x13a   : > { %1560 = vmatpush3.msra.mxu0 %v757_v23  ;;  %1614 = vmatpush3.msra.mxu1 %v942_v32  ;;  %v737_v51 = vld [vmem:[#allocation2 + $0x8] sm:$0xff]  ;;  %v740_v54 = vld [vmem:[#allocation2 + $0x20] sm:$0xff]  ;;  %v742_v56 = vld [vmem:[#allocation2 + $0x38] sm:$0xff] }
 0x13b   : > { %1561 = vmatprep.subr.mxu0 %v756_v24  ;;  %1615 = vmatprep.subr.mxu1 %v941_v34  ;;  %v738_v52 = vld [vmem:[#allocation2 + $0x48] sm:$0xff]  ;;  %v743_v57 = vld [vmem:[#allocation2 + $0x60] sm:$0xff]  ;;  %v744_v58 = vld [vmem:[#allocation2 + $0x70] sm:$0xff] }
 0x13c   : > { %1562 = vmatpush3.msra.mxu0 %v756_v24  ;;  %1616 = vmatpush3.msra.mxu1 %v941_v34  ;;  %v745_v59 = vld [vmem:[#allocation2 + $0x78] sm:$0xff]  ;;  %v746_v60 = vld [vmem:[#allocation2 + $0x28] sm:$0xff]  ;;  %v933_v62 = vld [vmem:[%s2160_s4 + $0x10] sm:$0xff] }
 0x13d   : > { %1563 = vmatprep.subr.mxu0 %v755_v27  ;;  %1617 = vmatprep.subr.mxu1 %v940_v36  ;;  %v934_v61 = vld [vmem:[%s2160_s4 + $0x18] sm:$0xff]  ;;  %v932_v63 = vld [vmem:[%s2160_s4 + $0x8] sm:$0xff]  ;;  %v931_v0 = vld [vmem:[%s2160_s4] sm:$0xff] }
 0x13e   : > { %1564 = vmatpush3.msra.mxu0 %v755_v27  ;;  %1618 = vmatpush3.msra.mxu1 %v940_v36  ;;  %v1351_v1 = vld [vmem:[%s2159_s3] ss:$0 sm:$0xff] }
 0x13f   : > { %1565 = vmatprep.subr.mxu0 %v754_v29  ;;  %1619 = vmatprep.subr.mxu1 %v939_v38 }
 0x140   : > { %1566 = vmatpush3.msra.mxu0 %v754_v29  ;;  %1620 = vmatpush3.msra.mxu1 %v939_v38 }
 0x141   : > { %1567 = vmatprep.subr.mxu0 %v753_v31  ;;  %1621 = vmatprep.subr.mxu1 %v938_v40 }
 0x142   : > { %1568 = vmatpush3.msra.mxu0 %v753_v31  ;;  %1622 = vmatpush3.msra.mxu1 %v938_v40 }
 0x143   : > { %1569 = vmatprep.subr.mxu0 %v752_v33  ;;  %1623 = vmatprep.subr.mxu1 %v937_v42 }
 0x144   : > { %1570 = vmatpush3.msra.mxu0 %v752_v33  ;;  %1624 = vmatpush3.msra.mxu1 %v937_v42 }
 0x145   : > { %1571 = vmatprep.subr.mxu0 %v751_v35  ;;  %1625 = vmatprep.subr.mxu1 %v936_v44 }
 0x146   : > { %1572 = vmatpush3.msra.mxu0 %v751_v35  ;;  %1626 = vmatpush3.msra.mxu1 %v936_v44 }
 0x147   : > { %1573 = vmatprep.subr.mxu0 %v750_v37  ;;  %1627 = vmatprep.subr.mxu1 %v935_v46 }
 0x148   : > { %1574 = vmatpush3.msra.mxu0 %v750_v37  ;;  %1628 = vmatpush3.msra.mxu1 %v935_v46 }
 0x149   : > { %1575 = vmatprep.subr.mxu0 %v749_v39  ;;  %1629 = vmatprep.subr.mxu1 %v934_v61 }
 0x14a   : > { %1576 = vmatpush3.msra.mxu0 %v749_v39  ;;  %1630 = vmatpush3.msra.mxu1 %v934_v61 }
 0x14b   : > { %1577 = vmatprep.subr.mxu0 %v748_v41  ;;  %1631 = vmatprep.subr.mxu1 %v933_v62 }
 0x14c   : > { %1578 = vmatpush3.msra.mxu0 %v748_v41  ;;  %1632 = vmatpush3.msra.mxu1 %v933_v62 }
 0x14d   : > { %1579 = vmatprep.subr.mxu0 %v747_v43  ;;  %1633 = vmatprep.subr.mxu1 %v932_v63 }
 0x14e   : > { %1580 = vmatpush3.msra.mxu0 %v747_v43  ;;  %1634 = vmatpush3.msra.mxu1 %v932_v63 }
 0x14f   : > { %1582 = vmatmul.mubr.f32.vlgmr.msra.gmra.mxu0 %v732_v45  ;;  %1635 = vmatprep.subr.mxu1 %v931_v0 }
 0x150   : > { %1584 = vmatprep.mubr.f32.mxu0 %v733_v47  ;;  %1636 = vmatpush3.msra.mxu1 %v931_v0 }
 0x153   : > { %1585 = vmatmul.mubr.f32.gmra.mxu0 %v734_v48 }
 0x154   : > { %1587 = vmatprep.mubr.f32.mxu0 %v735_v49 }
 0x157   : > { %1588 = vmatmul.mubr.f32.gmra.mxu0 %v736_v50  ;;  %v2067_v50 = vld [vmem:[%s2161_s5] ss:$0 sm:$0xff] }
 0x158   : > { %1590 = vmatprep.mubr.f32.mxu0 %v737_v51 }
 0x15b   : > { %1591 = vmatmul.mubr.f32.gmra.mxu0 %v738_v52 }
 0x15c   : > { %1593 = vmatprep.mubr.f32.mxu0 %v739_v53  ;;  %v2073_v53 = vld [vmem:[%s2162_s6] ss:$0 sm:$0xff] }
 0x15f   : > { %1594 = vmatmul.mubr.f32.gmra.mxu0 %v740_v54 }
 0x160   : > { %1596 = vmatprep.mubr.f32.mxu0 %v741_v55 }
 0x163   : > { %1597 = vmatmul.mubr.f32.gmra.mxu0 %v742_v56 }
 0x164   : > { %1599 = vmatprep.mubr.f32.mxu0 %v743_v57 }
 0x167   : > { %1600 = vmatmul.mubr.f32.gmra.mxu0 %v744_v58 }
 0x168   : > { %1602 = vmatprep.mubr.f32.mxu0 %v745_v59  ;;  %v2080_v59 = vld [vmem:[%s2163_s7] ss:$0 sm:$0xff] }
 0x16b   : > { %1603 = vmatmul.mubr.f32.gmra.mxu0 %v746_v60 }
 0x20f   : > { %v1583_v2 = vpop.f32.mrf.mxu0 }
 0x210   : > { %v842_v3 = vadd.f32 %v1583_v2, %v1351_v1 }
 0x211   : > { %v836_v4 = vpop.f32.mrf.mxu0 }
 0x212   : > { %v837_v5 = vadd.f32 %v1351_v1, %v836_v4  ;;  %v916_v8 = vmax.f32 %v842_v3, 0.0 }
 0x213   : > { %v1586_v6 = vpop.f32.mrf.mxu0 }
 0x214   : > { %v915_v7 = vmax.f32 %v837_v5, 0.0  ;;  %v852_v9 = vadd.f32 %v1586_v6, %v1351_v1 }
 0x215   : > { %v846_v10 = vpop.f32.mrf.mxu0 }
 0x216   : > { %v847_v11 = vadd.f32 %v1351_v1, %v846_v10  ;;  %1637 = vmatprep.mubr.f32.mxu1 %v915_v7  ;;  %v918_v14 = vmax.f32 %v852_v9, 0.0 }
 0x217   : > { %v1589_v12 = vpop.f32.mrf.mxu0  ;;  %1638 = vmatmul.mubr.f32.vlgmr.msra.gmra.mxu1 %v916_v8 }
 0x218   : > { %v917_v13 = vmax.f32 %v847_v11, 0.0  ;;  %v862_v15 = vadd.f32 %v1589_v12, %v1351_v1 }
 0x219   : > { %v856_v16 = vpop.f32.mrf.mxu0 }
 0x21a   : > { %v857_v17 = vadd.f32 %v1351_v1, %v856_v16  ;;  %1640 = vmatprep.mubr.f32.mxu1 %v917_v13  ;;  %v920_v20 = vmax.f32 %v862_v15, 0.0 }
 0x21b   : > { %v1592_v18 = vpop.f32.mrf.mxu0  ;;  %1641 = vmatmul.mubr.f32.gmra.mxu1 %v918_v14 }
 0x21c   : > { %v919_v19 = vmax.f32 %v857_v17, 0.0  ;;  %v872_v21 = vadd.f32 %v1592_v18, %v1351_v1 }
 0x21d   : > { %v866_v22 = vpop.f32.mrf.mxu0 }
 0x21e   : > { %v867_v23 = vadd.f32 %v1351_v1, %v866_v22  ;;  %1643 = vmatprep.mubr.f32.mxu1 %v919_v19  ;;  %v922_v26 = vmax.f32 %v872_v21, 0.0 }
 0x21f   : > { %v1595_v24 = vpop.f32.mrf.mxu0  ;;  %1644 = vmatmul.mubr.f32.gmra.mxu1 %v920_v20 }
 0x220   : > { %v921_v25 = vmax.f32 %v867_v23, 0.0  ;;  %v882_v27 = vadd.f32 %v1595_v24, %v1351_v1 }
 0x221   : > { %v876_v28 = vpop.f32.mrf.mxu0 }
 0x222   : > { %v877_v29 = vadd.f32 %v1351_v1, %v876_v28  ;;  %1646 = vmatprep.mubr.f32.mxu1 %v921_v25  ;;  %v924_v32 = vmax.f32 %v882_v27, 0.0 }
 0x223   : > { %v1598_v30 = vpop.f32.mrf.mxu0  ;;  %1647 = vmatmul.mubr.f32.gmra.mxu1 %v922_v26 }
 0x224   : > { %v923_v31 = vmax.f32 %v877_v29, 0.0  ;;  %v892_v33 = vadd.f32 %v1598_v30, %v1351_v1 }
 0x225   : > { %v886_v34 = vpop.f32.mrf.mxu0 }
 0x226   : > { %v887_v35 = vadd.f32 %v1351_v1, %v886_v34  ;;  %1649 = vmatprep.mubr.f32.mxu1 %v923_v31  ;;  %v926_v38 = vmax.f32 %v892_v33, 0.0 }
 0x227   : > { %v1601_v36 = vpop.f32.mrf.mxu0  ;;  %1650 = vmatmul.mubr.f32.gmra.mxu1 %v924_v32 }
 0x228   : > { %v925_v37 = vmax.f32 %v887_v35, 0.0  ;;  %v902_v39 = vadd.f32 %v1601_v36, %v1351_v1 }
 0x229   : > { %v896_v40 = vpop.f32.mrf.mxu0 }
 0x22a   : > { %v897_v41 = vadd.f32 %v1351_v1, %v896_v40  ;;  %1652 = vmatprep.mubr.f32.mxu1 %v925_v37  ;;  %v928_v44 = vmax.f32 %v902_v39, 0.0 }
 0x22b   : > { %v1604_v42 = vpop.f32.mrf.mxu0  ;;  %1653 = vmatmul.mubr.f32.gmra.mxu1 %v926_v38 }
 0x22c   : > { %v927_v43 = vmax.f32 %v897_v41, 0.0  ;;  %v912_v45 = vadd.f32 %v1604_v42, %v1351_v1 }
 0x22d   : > { %v906_v46 = vpop.f32.mrf.mxu0 }
 0x22e   : > { %v907_v47 = vadd.f32 %v1351_v1, %v906_v46  ;;  %1655 = vmatprep.mubr.f32.mxu1 %v927_v43  ;;  %v930_v49 = vmax.f32 %v912_v45, 0.0 }
 0x22f   : > { %1656 = vmatmul.mubr.f32.gmra.mxu1 %v928_v44 }
 0x230   : > { %v929_v48 = vmax.f32 %v907_v47, 0.0 }
 0x232   : > { %1658 = vmatprep.mubr.f32.mxu1 %v929_v48 }
 0x233   : > { %1659 = vmatmul.mubr.f32.gmra.mxu1 %v930_v49 }
 0x2d7   : > { %v1639_v51 = vpop.f32.mrf.mxu1 }
 0x2d8   : > { %v1026_v52 = vadd.f32 %v1639_v51, %v2067_v50 }
 0x2d9   : > { %v1020_v54 = vpop.f32.mrf.mxu1 }
 0x2da   : > { %v1100_v55 = vmax.f32 %v1026_v52, 0.0  ;;  %v1021_v56 = vadd.f32 %v2067_v50, %v1020_v54 }
 0x2db   : > { %v1642_v57 = vpop.f32.mrf.mxu1 }
 0x2dc   : > { %v1123_v58 = vmul.f32 %v2073_v53, %v1100_v55  ;;  %v1099_v60 = vmax.f32 %v1021_v56, 0.0  ;;  %v1036_v61 = vadd.f32 %v1642_v57, %v2067_v50 }
 0x2dd   : > { %v1030_v62 = vpop.f32.mrf.mxu1 }
 0x2de   : > { %v1122_v63 = vmul.f32 %v2073_v53, %v1099_v60  ;;  %v1102_v0 = vmax.f32 %v1036_v61, 0.0  ;;  %v1031_v1 = vadd.f32 %v2067_v50, %v1030_v62  ;;  %v1146_v2 = vadd.f32 %v2080_v59, %v1123_v58 }
 0x2df   : > { %v1645_v3 = vpop.f32.mrf.mxu1 }
 0x2e0   : > { %v1145_v4 = vadd.f32 %v2080_v59, %v1122_v63  ;;  %v1125_v5 = vmul.f32 %v2073_v53, %v1102_v0  ;;  %v1101_v6 = vmax.f32 %v1031_v1, 0.0  ;;  %v1046_v7 = vadd.f32 %v1645_v3, %v2067_v50 }
 0x2e1   : > { %v1040_v8 = vpop.f32.mrf.mxu1 }
 0x2e2   : > { %v1393_v9 = vpack.c.bf16 %v1146_v2, %v1145_v4  ;;  %v1124_v10 = vmul.f32 %v2073_v53, %v1101_v6  ;;  %v1104_v11 = vmax.f32 %v1046_v7, 0.0  ;;  %v1041_v12 = vadd.f32 %v2067_v50, %v1040_v8 }
 0x2e3   : > { %v1648_v13 = vpop.f32.mrf.mxu1  ;;  %v1148_v14 = vadd.f32 %v2080_v59, %v1125_v5 }
 0x2e4   : > { %1394 = vst [vmem:[%s1937_s22] sm:$0xff] %v1393_v9   ;;  %v1147_v15 = vadd.f32 %v2080_v59, %v1124_v10  ;;  %v1056_v16 = vadd.f32 %v1648_v13, %v2067_v50  ;;  %v1127_v17 = vmul.f32 %v2073_v53, %v1104_v11  ;;  %v1103_v18 = vmax.f32 %v1041_v12, 0.0 }
 0x2e5   : > { %v1050_v19 = vpop.f32.mrf.mxu1 }
 0x2e6   : > { %v1398_v20 = vpack.c.bf16 %v1148_v14, %v1147_v15  ;;  %v1106_v21 = vmax.f32 %v1056_v16, 0.0  ;;  %v1051_v22 = vadd.f32 %v2067_v50, %v1050_v19  ;;  %v1126_v23 = vmul.f32 %v2073_v53, %v1103_v18 }
 0x2e7   : > { %v1651_v24 = vpop.f32.mrf.mxu1  ;;  %v1150_v28 = vadd.f32 %v2080_v59, %v1127_v17 }
 0x2e8   : > { %1430 = vst [vmem:[%s1937_s22 + $0x8] sm:$0xff] %v1398_v20   ;;  %v1129_v25 = vmul.f32 %v2073_v53, %v1106_v21  ;;  %v1105_v26 = vmax.f32 %v1051_v22, 0.0  ;;  %v1066_v27 = vadd.f32 %v1651_v24, %v2067_v50  ;;  %v1149_v29 = vadd.f32 %v2080_v59, %v1126_v23 }
 0x2e9   : > { %v1060_v30 = vpop.f32.mrf.mxu1 }
 0x2ea   : > { %v1128_v31 = vmul.f32 %v2073_v53, %v1105_v26  ;;  %v1108_v32 = vmax.f32 %v1066_v27, 0.0  ;;  %v1061_v33 = vadd.f32 %v2067_v50, %v1060_v30  ;;  %v1403_v34 = vpack.c.bf16 %v1150_v28, %v1149_v29 }
 0x2eb   : > { %v1152_v35 = vadd.f32 %v2080_v59, %v1129_v25  ;;  %v1654_v36 = vpop.f32.mrf.mxu1 }
 0x2ec   : > { %v1151_v37 = vadd.f32 %v2080_v59, %v1128_v31  ;;  %v1131_v38 = vmul.f32 %v2073_v53, %v1108_v32  ;;  %v1107_v39 = vmax.f32 %v1061_v33, 0.0  ;;  %v1076_v40 = vadd.f32 %v1654_v36, %v2067_v50  ;;  %1431 = vst [vmem:[%s1937_s22 + $0x10] sm:$0xff] %v1403_v34  }
 0x2ed   : > { %v1070_v41 = vpop.f32.mrf.mxu1 }
 0x2ee   : > { %v1408_v42 = vpack.c.bf16 %v1152_v35, %v1151_v37  ;;  %v1130_v43 = vmul.f32 %v2073_v53, %v1107_v39  ;;  %v1110_v44 = vmax.f32 %v1076_v40, 0.0  ;;  %v1071_v45 = vadd.f32 %v2067_v50, %v1070_v41 }
 0x2ef   : > { %v1657_v46 = vpop.f32.mrf.mxu1  ;;  %v1154_v47 = vadd.f32 %v2080_v59, %v1131_v38 }
 0x2f0   : > { %1432 = vst [vmem:[%s1937_s22 + $0x18] sm:$0xff] %v1408_v42   ;;  %v1153_v48 = vadd.f32 %v2080_v59, %v1130_v43  ;;  %v1086_v49 = vadd.f32 %v1657_v46, %v2067_v50  ;;  %v1133_v51 = vmul.f32 %v2073_v53, %v1110_v44  ;;  %v1109_v52 = vmax.f32 %v1071_v45, 0.0 }
 0x2f1   : > { %v1080_v54 = vpop.f32.mrf.mxu1 }
 0x2f2   : > { %v1413_v55 = vpack.c.bf16 %v1154_v47, %v1153_v48  ;;  %v1112_v56 = vmax.f32 %v1086_v49, 0.0  ;;  %v1081_v57 = vadd.f32 %v2067_v50, %v1080_v54  ;;  %v1132_v58 = vmul.f32 %v2073_v53, %v1109_v52 }
 0x2f3   : > { %v1660_v60 = vpop.f32.mrf.mxu1  ;;  %v1156_v0 = vadd.f32 %v2080_v59, %v1133_v51 }
 0x2f4   : > { %1433 = vst [vmem:[%s1937_s22 + $0x20] sm:$0xff] %v1413_v55   ;;  %v1135_v61 = vmul.f32 %v2073_v53, %v1112_v56  ;;  %v1111_v62 = vmax.f32 %v1081_v57, 0.0  ;;  %v1096_v63 = vadd.f32 %v1660_v60, %v2067_v50  ;;  %v1155_v1 = vadd.f32 %v2080_v59, %v1132_v58 }
 0x2f5   : > { %v1090_v2 = vpop.f32.mrf.mxu1 }
 0x2f6   : > { %v1134_v3 = vmul.f32 %v2073_v53, %v1111_v62  ;;  %v1114_v4 = vmax.f32 %v1096_v63, 0.0  ;;  %v1091_v5 = vadd.f32 %v2067_v50, %v1090_v2  ;;  %v1418_v6 = vpack.c.bf16 %v1156_v0, %v1155_v1 }
 0x2f7   : > { %v1158_v7 = vadd.f32 %v2080_v59, %v1135_v61 }
 0x2f8   : > { %v1157_v8 = vadd.f32 %v2080_v59, %v1134_v3  ;;  %v1137_v9 = vmul.f32 %v2073_v53, %v1114_v4  ;;  %v1113_v10 = vmax.f32 %v1091_v5, 0.0  ;;  %1434 = vst [vmem:[%s1937_s22 + $0x28] sm:$0xff] %v1418_v6  }
 0x2fa   : > { %v1423_v11 = vpack.c.bf16 %v1158_v7, %v1157_v8  ;;  %v1136_v12 = vmul.f32 %v2073_v53, %v1113_v10  ;;  %v1160_v13 = vadd.f32 %v2080_v59, %v1137_v9 }
 0x2fc   : > { %1435 = vst [vmem:[%s1937_s22 + $0x30] sm:$0xff] %v1423_v11   ;;  %v1159_v14 = vadd.f32 %v2080_v59, %v1136_v12 }
 0x2fe   : > { %v1428_v15 = vpack.c.bf16 %v1160_v13, %v1159_v14 }
 0x300   : > { %1436 = vst [vmem:[%s1937_s22 + $0x38] sm:$0xff] %v1428_v15  }
 0x301 PF: > { %s18_s11 = sadd.s32 1, %s1804_s11   ;;  %s2165_s27 = smov %s1784_s28 }
 0x302   : > { %p15_p13 = scmp.ge.s32.totalorder %s18_s11, 6   ;;  %s2166_s28 = smov %s1903_s18 }
 0x303   : > { %s2167_s29 = smov %s1796_s9  ;;  %s2168_s30 = smov %s1800_s10 }
 0x304   : > { %s2169_s9 = smov %s2172_s12  ;;  %s2170_s10 = smov %s2176_s13 }
 0x305   :  { %17 = sbr.rel (!%p15_p13) target bundleno = 4 (0x4), region = 137 }

</bundles_post_ra>
